<compile_context>
chip_gen: v7x
topology: tpu7x:2x2x1
jax: 0.10.0
libtpu: 0.0.40
codegen_flags: <defaults>
</compile_context>

<pallas_src>
import functools

import numpy as np
import jax
import jax.numpy as jnp
from jax import lax
from jax.experimental import pallas as pl
from jax.experimental.pallas import tpu as pltpu

EPS = 1e-5


def _zero_map(nd):
    return lambda: (0,) * nd


# ---------------------------------------------------------------------------
# Fused Pallas kernel: upsample + concat + (conv3x3 + BN + ReLU) x 2
# ---------------------------------------------------------------------------
def _decoder_block_kernel(x_ref, skip_ref, m_ref, bup_ref, mtop_ref, mbot_ref,
                          g1_ref, b1_ref, k1_ref, k1t_ref, gm1_ref, bt1_ref,
                          g2_ref, b2_ref, k2_ref, k2t_ref, gm2_ref, bt2_ref,
                          o_ref, *, inv_count):
    f32 = jnp.float32
    nrows = x_ref.shape[0]                      # N * H2 (rows of every activation)

    def mm(a, b):
        return jnp.dot(a, b, preferred_element_type=f32)

    # ---- ConvTranspose2d(k2,s2) + channel concat with skip -----------------
    # x rows are already in output-row order (row 2i+di holds input row i in
    # lane block di), so one matmul against the stacked folded weight gives the
    # upsampled rows in place; skip + bias are pre-placed in the cat lane layout.
    catx = skip_ref[...] + bup_ref[...] + mm(x_ref[...], m_ref[...])

    mask_top = mtop_ref[...]                    # 0 at the first row of every image
    mask_bot = mbot_ref[...]                    # 0 at the last  row of every image

    def conv3x3_bn_relu(inp, g_ref, brow, k_ref, kt_ref, gam, bet):
        # 3x3 conv: kx taps + x zero-padding live inside the banded G_ky
        # matrices; ky taps are sublane rolls + boundary masks (no R matmuls).
        q0 = mm(inp, g_ref[0])                  # tap ky=0 -> needs row y-1
        q1 = mm(inp, g_ref[1])                  # tap ky=1 -> row y
        q2 = mm(inp, g_ref[2])                  # tap ky=2 -> needs row y+1
        h = (brow + q1
             + mask_top * pltpu.roll(q0, shift=1, axis=0)
             + mask_bot * pltpu.roll(q2, shift=nrows - 1, axis=0))

        # BatchNorm (training mode): centered two-pass batch statistics over
        # all N*H2*W2 valid positions.  K / K^T map lanes <-> channels; x-pad
        # lanes have all-zero K rows so they never pollute the stats.
        s = jnp.sum(h, axis=0, keepdims=True)                  # (1, L)
        mean_c = mm(s, k_ref[...]) * inv_count                 # (1, C)
        mean_l = mm(mean_c, kt_ref[...])                       # (1, L), 0 at pad lanes
        d = h - mean_l
        v = jnp.sum(d * d, axis=0, keepdims=True)              # (1, L)
        var_c = mm(v, k_ref[...]) * inv_count                  # biased variance
        var_l = mm(var_c, kt_ref[...])
        y = d * lax.rsqrt(var_l + EPS) * gam + bet
        return jnp.maximum(y, 0.0)

    h1 = conv3x3_bn_relu(catx, g1_ref, b1_ref[...], k1_ref, k1t_ref,
                         gm1_ref[...], bt1_ref[...])
    h2 = conv3x3_bn_relu(h1, g2_ref, b2_ref[...], k2_ref, k2t_ref,
                         gm2_ref[...], bt2_ref[...])
    o_ref[...] = h2.astype(o_ref.dtype)


# ---------------------------------------------------------------------------
# One-time weight folding (hoisted out of the per-call path).
# Depends only on W and the channel counts — NOT on N or H.
# ---------------------------------------------------------------------------
def fold_decoder_params(params, *, width, skip_channels):
    f32 = jnp.float32
    Cin, Cout = params["up_w"].shape[0], params["up_w"].shape[1]
    Ccat = Cout + skip_channels
    W = width
    W2 = 2 * W
    Wp = W2 + 2                                    # x slots incl. 1-pixel zero pad

    # structural 0/1 matrices (shape-only, numpy)
    E = np.zeros((2, W, Wp), np.float32)           # input x j, tap dj -> slot 2j+dj+1
    for dj in range(2):
        E[dj, np.arange(W), 2 * np.arange(W) + dj + 1] = 1.0
    D1 = np.zeros((3, Wp, Wp), np.float32)         # src slot -> conv1 out slot (padded)
    D2 = np.zeros((3, Wp, W2), np.float32)         # src slot -> conv2 out x (dense)
    for kx in range(3):
        D1[kx, np.arange(W2) + kx, np.arange(W2) + 1] = 1.0
        D2[kx, np.arange(W2) + kx, np.arange(W2)] = 1.0
    v_valid = np.zeros((Wp,), np.float32)
    v_valid[1:1 + W2] = 1.0
    v_row = v_valid.reshape(1, Wp)
    K1 = np.kron(v_valid.reshape(Wp, 1), np.eye(Cout, dtype=np.float32))       # (Wp*Cout, Cout)
    K2 = np.kron(np.ones((W2, 1), np.float32), np.eye(Cout, dtype=np.float32))  # (W2*Cout, Cout)

    # ConvTranspose2d weights -> single stacked banded matrix (di blocks on rows)
    up_w = params["up_w"].astype(f32)              # (Cin, Cout, 2, 2)
    m_blocks = []
    for di in range(2):
        m = jnp.zeros((W * Cin, Wp * Ccat), f32)
        for dj in range(2):
            blk = jnp.pad(up_w[:, :, di, dj], ((0, 0), (0, Ccat - Cout)))
            m = m + jnp.kron(jnp.asarray(E[dj]), blk)
        m_blocks.append(m)
    m_stack = jnp.concatenate(m_blocks, axis=0)    # (2*W*Cin, Wp*Ccat)
    bias_up = jnp.kron(jnp.asarray(v_row),
                       jnp.pad(params["up_b"].astype(f32),
                               (0, Ccat - Cout)).reshape(1, Ccat))

    c1_w = params["c1_w"].astype(f32)              # (Cout, Ccat, 3, 3)
    g1 = jnp.stack([
        sum(jnp.kron(jnp.asarray(D1[kx]), c1_w[:, :, ky, kx].T) for kx in range(3))
        for ky in range(3)], axis=0)               # (3, Wp*Ccat, Wp*Cout)
    b1 = jnp.kron(jnp.asarray(v_row), params["c1_b"].astype(f32).reshape(1, Cout))
    gm1 = jnp.kron(jnp.asarray(v_row), params["bn1_g"].astype(f32).reshape(1, Cout))
    bt1 = jnp.kron(jnp.asarray(v_row), params["bn1_b"].astype(f32).reshape(1, Cout))

    c2_w = params["c2_w"].astype(f32)              # (Cout, Cout, 3, 3)
    g2 = jnp.stack([
        sum(jnp.kron(jnp.asarray(D2[kx]), c2_w[:, :, ky, kx].T) for kx in range(3))
        for ky in range(3)], axis=0)               # (3, Wp*Cout, W2*Cout)
    b2 = jnp.tile(params["c2_b"].astype(f32), W2).reshape(1, W2 * Cout)
    gm2 = jnp.tile(params["bn2_g"].astype(f32), W2).reshape(1, W2 * Cout)
    bt2 = jnp.tile(params["bn2_b"].astype(f32), W2).reshape(1, W2 * Cout)

    return dict(m_stack=m_stack, bias_up=bias_up,
                g1=g1, b1=b1, k1=jnp.asarray(K1), k1t=jnp.asarray(K1.T),
                gm1=gm1, bt1=bt1,
                g2=g2, b2=b2, k2=jnp.asarray(K2), k2t=jnp.asarray(K2.T),
                gm2=gm2, bt2=bt2)


# ---------------------------------------------------------------------------
# Forward: thin per-call layout glue + a single pallas_call
# ---------------------------------------------------------------------------
def decoder_block_forward(x_nchw, skip_nchw, folded):
    N, Cin, H, W = x_nchw.shape
    Cskip = skip_nchw.shape[1]
    Cout = folded["k1"].shape[1]
    Ccat = Cout + Cskip
    H2, W2 = 2 * H, 2 * W
    Wp = W2 + 2
    f32 = jnp.float32

    # x -> (N*H2, 2*W*Cin): row 2i+di holds image row i in lane block di, so the
    # stride-2 row interleave of the transposed conv becomes a single matmul.
    x_r = jnp.transpose(x_nchw, (0, 2, 3, 1)).reshape(N, H, 1, W * Cin).astype(f32)
    z = jnp.zeros_like(x_r)
    x_exp = jnp.concatenate(
        [jnp.concatenate([x_r, z], axis=-1),
         jnp.concatenate([z, x_r], axis=-1)], axis=2).reshape(N * H2, 2 * W * Cin)

    # skip, pre-placed into the concat lane layout (channels Cout..Ccat, x 1..W2)
    skip_pre = jnp.pad(jnp.transpose(skip_nchw, (0, 2, 3, 1)).astype(f32),
                       ((0, 0), (0, 0), (1, 1), (Cout, 0))).reshape(N * H2, Wp * Ccat)

    # per-image boundary-row masks for the ky sublane shifts (0/1 columns)
    row_in_img = np.arange(N * H2) % H2
    mask_top = jnp.asarray((row_in_img != 0).astype(np.float32).reshape(N * H2, 1))
    mask_bot = jnp.asarray((row_in_img != H2 - 1).astype(np.float32).reshape(N * H2, 1))

    inputs = (x_exp, skip_pre, folded["m_stack"], folded["bias_up"],
              mask_top, mask_bot,
              folded["g1"], folded["b1"], folded["k1"], folded["k1t"],
              folded["gm1"], folded["bt1"],
              folded["g2"], folded["b2"], folded["k2"], folded["k2t"],
              folded["gm2"], folded["bt2"])

    kernel = functools.partial(_decoder_block_kernel,
                               inv_count=float(1.0 / (N * H2 * W2)))

    out2d = pl.pallas_call(
        kernel,
        out_shape=jax.ShapeDtypeStruct((N * H2, W2 * Cout), f32),
        in_specs=[pl.BlockSpec(a.shape, _zero_map(a.ndim)) for a in inputs],
        out_specs=pl.BlockSpec((N * H2, W2 * Cout), _zero_map(2)),
        compiler_params=pltpu.CompilerParams(
            # explicit scoped-VMEM budget with v7x (64 MiB physical) headroom
            vmem_limit_bytes=32 * 1024 * 1024),
    )(*inputs)

    # free reshape + single boundary transpose back to NCHW
    return out2d.reshape(N, H2, W2, Cout).transpose(0, 3, 1, 2)


# ---------------------------------------------------------------------------
# Pure-JAX reference (mirrors PyTorch semantics) for a sanity check
# ---------------------------------------------------------------------------
def _bn_relu_ref(x, gamma, beta):
    mean = jnp.mean(x, axis=(0, 2, 3), keepdims=True)
    var = jnp.mean(jnp.square(x - mean), axis=(0, 2, 3), keepdims=True)
    y = (x - mean) * lax.rsqrt(var + EPS)
    y = y * gamma.reshape(1, -1, 1, 1) + beta.reshape(1, -1, 1, 1)
    return jnp.maximum(y, 0.0)


def reference_forward(x, skip, params):
    N, Cin, H, W = x.shape
    Cout = params["up_w"].shape[1]
    up = jnp.einsum("nchw,cdij->ndhiwj", x, params["up_w"]).reshape(N, Cout, 2 * H, 2 * W)
    up = up + params["up_b"].reshape(1, Cout, 1, 1)
    cat = jnp.concatenate([up, skip], axis=1)
    dn = ("NCHW", "OIHW", "NCHW")
    h1 = lax.conv_general_dilated(cat, params["c1_w"], (1, 1), "SAME",
                                  dimension_numbers=dn) + params["c1_b"].reshape(1, -1, 1, 1)
    h1 = _bn_relu_ref(h1, params["bn1_g"], params["bn1_b"])
    h2 = lax.conv_general_dilated(h1, params["c2_w"], (1, 1), "SAME",
                                  dimension_numbers=dn) + params["c2_b"].reshape(1, -1, 1, 1)
    h2 = _bn_relu_ref(h2, params["bn2_g"], params["bn2_b"])
    return h2


# ---------------------------------------------------------------------------
if __name__ == "__main__":
    in_channels, out_channels = 8, 4
    N, H, W = 2, 8, 8                       # x: (2, 8, 8, 8); skip: (2, 4, 16, 16)
    skip_channels = in_channels - out_channels

    key = jax.random.PRNGKey(0)
    ks = jax.random.split(key, 12)

    params = {
        "up_w": 0.2 * jax.random.normal(ks[0], (in_channels, out_channels, 2, 2), jnp.float32),
        "up_b": 0.1 * jax.random.normal(ks[1], (out_channels,), jnp.float32),
        "c1_w": 0.2 * jax.random.normal(ks[2], (out_channels, in_channels, 3, 3), jnp.float32),
        "c1_b": 0.1 * jax.random.normal(ks[3], (out_channels,), jnp.float32),
        "bn1_g": 1.0 + 0.1 * jax.random.normal(ks[4], (out_channels,), jnp.float32),
        "bn1_b": 0.1 * jax.random.normal(ks[5], (out_channels,), jnp.float32),
        "c2_w": 0.2 * jax.random.normal(ks[6], (out_channels, out_channels, 3, 3), jnp.float32),
        "c2_b": 0.1 * jax.random.normal(ks[7], (out_channels,), jnp.float32),
        "bn2_g": 1.0 + 0.1 * jax.random.normal(ks[8], (out_channels,), jnp.float32),
        "bn2_b": 0.1 * jax.random.normal(ks[9], (out_channels,), jnp.float32),
    }

    x = jax.random.normal(ks[10], (N, in_channels, H, W), jnp.float32)
    skip = jax.random.normal(ks[11], (N, skip_channels, 2 * H, 2 * W), jnp.float32)

    # one-time weight folding, hoisted out of the per-call (jitted) path
    folded = fold_decoder_params(params, width=W, skip_channels=skip_channels)
    folded = jax.tree_util.tree_map(jax.block_until_ready, folded)

    fwd = jax.jit(decoder_block_forward)
    out = jax.block_until_ready(fwd(x, skip, folded))

    ref = jax.block_until_ready(reference_forward(x, skip, params))
    assert out.shape == (N, out_channels, 2 * H, 2 * W), out.shape
    np.testing.assert_allclose(np.asarray(out), np.asarray(ref), rtol=2e-2, atol=2e-3)

    print("KERNEL_OK")
</pallas_src>

<mosaic_0001>
module attributes {stable_mosaic.version = 11 : i64} {
  func.func @_decoder_block_kernel(%arg0: memref<32x128xf32, #tpu.memory_space<vmem>>, %arg1: memref<32x144xf32, #tpu.memory_space<vmem>>, %arg2: memref<128x144xf32, #tpu.memory_space<vmem>>, %arg3: memref<1x144xf32, #tpu.memory_space<vmem>>, %arg4: memref<32x1xf32, #tpu.memory_space<vmem>>, %arg5: memref<32x1xf32, #tpu.memory_space<vmem>>, %arg6: memref<3x144x72xf32, #tpu.memory_space<vmem>>, %arg7: memref<1x72xf32, #tpu.memory_space<vmem>>, %arg8: memref<72x4xf32, #tpu.memory_space<vmem>>, %arg9: memref<4x72xf32, #tpu.memory_space<vmem>>, %arg10: memref<1x72xf32, #tpu.memory_space<vmem>>, %arg11: memref<1x72xf32, #tpu.memory_space<vmem>>, %arg12: memref<3x72x64xf32, #tpu.memory_space<vmem>>, %arg13: memref<1x64xf32, #tpu.memory_space<vmem>>, %arg14: memref<64x4xf32, #tpu.memory_space<vmem>>, %arg15: memref<4x64xf32, #tpu.memory_space<vmem>>, %arg16: memref<1x64xf32, #tpu.memory_space<vmem>>, %arg17: memref<1x64xf32, #tpu.memory_space<vmem>>, %arg18: memref<32x64xf32, #tpu.memory_space<vmem>>) attributes {dimension_semantics = [], scalar_prefetch = 0 : i64, scratch_operands = 0 : i64, tpu.core_type = #tpu.core_type<tc>} {
    %c0 = arith.constant 0 : index
    %c0_0 = arith.constant 0 : index
    %0 = vector.load %arg1[%c0, %c0_0] : memref<32x144xf32, #tpu.memory_space<vmem>>, vector<32x144xf32>
    %c0_1 = arith.constant 0 : index
    %c0_2 = arith.constant 0 : index
    %1 = vector.load %arg3[%c0_1, %c0_2] : memref<1x144xf32, #tpu.memory_space<vmem>>, vector<1x144xf32>
    %2 = vector.broadcast %1 : vector<1x144xf32> to vector<32x144xf32>
    %3 = arith.addf %0, %2 : vector<32x144xf32>
    %c0_3 = arith.constant 0 : index
    %c0_4 = arith.constant 0 : index
    %4 = vector.load %arg0[%c0_3, %c0_4] : memref<32x128xf32, #tpu.memory_space<vmem>>, vector<32x128xf32>
    %c0_5 = arith.constant 0 : index
    %c0_6 = arith.constant 0 : index
    %5 = vector.load %arg2[%c0_5, %c0_6] : memref<128x144xf32, #tpu.memory_space<vmem>>, vector<128x144xf32>
    %cst = arith.constant dense<0.000000e+00> : vector<32x144xf32>
    %6 = tpu.matmul %4, %5, %cst {dimension_numbers = #tpu.dot_dimension_numbers<[1], [0], [0], [1], [0, 0, 1, 1], [], []>} : vector<32x128xf32>, vector<128x144xf32>, vector<32x144xf32> -> vector<32x144xf32>
    %7 = arith.addf %3, %6 : vector<32x144xf32>
    %c0_7 = arith.constant 0 : index
    %c0_8 = arith.constant 0 : index
    %8 = vector.load %arg4[%c0_7, %c0_8] : memref<32x1xf32, #tpu.memory_space<vmem>>, vector<32x1xf32>
    %c0_9 = arith.constant 0 : index
    %c0_10 = arith.constant 0 : index
    %9 = vector.load %arg5[%c0_9, %c0_10] : memref<32x1xf32, #tpu.memory_space<vmem>>, vector<32x1xf32>
    %c0_11 = arith.constant 0 : index
    %c0_12 = arith.constant 0 : index
    %10 = vector.load %arg7[%c0_11, %c0_12] : memref<1x72xf32, #tpu.memory_space<vmem>>, vector<1x72xf32>
    %c0_13 = arith.constant 0 : index
    %c0_14 = arith.constant 0 : index
    %11 = vector.load %arg10[%c0_13, %c0_14] : memref<1x72xf32, #tpu.memory_space<vmem>>, vector<1x72xf32>
    %c0_15 = arith.constant 0 : index
    %c0_16 = arith.constant 0 : index
    %12 = vector.load %arg11[%c0_15, %c0_16] : memref<1x72xf32, #tpu.memory_space<vmem>>, vector<1x72xf32>
    %c0_17 = arith.constant 0 : index
    %c0_18 = arith.constant 0 : index
    %c0_19 = arith.constant 0 : index
    %13 = vector.load %arg6[%c0_17, %c0_18, %c0_19] : memref<3x144x72xf32, #tpu.memory_space<vmem>>, vector<1x144x72xf32>
    %14 = vector.shape_cast %13 : vector<1x144x72xf32> to vector<144x72xf32>
    %cst_20 = arith.constant dense<0.000000e+00> : vector<32x72xf32>
    %15 = tpu.matmul %7, %14, %cst_20 {dimension_numbers = #tpu.dot_dimension_numbers<[1], [0], [0], [1], [0, 0, 1, 1], [], []>} : vector<32x144xf32>, vector<144x72xf32>, vector<32x72xf32> -> vector<32x72xf32>
    %c1 = arith.constant 1 : index
    %c0_21 = arith.constant 0 : index
    %c0_22 = arith.constant 0 : index
    %16 = vector.load %arg6[%c1, %c0_21, %c0_22] : memref<3x144x72xf32, #tpu.memory_space<vmem>>, vector<1x144x72xf32>
    %17 = vector.shape_cast %16 : vector<1x144x72xf32> to vector<144x72xf32>
    %cst_23 = arith.constant dense<0.000000e+00> : vector<32x72xf32>
    %18 = tpu.matmul %7, %17, %cst_23 {dimension_numbers = #tpu.dot_dimension_numbers<[1], [0], [0], [1], [0, 0, 1, 1], [], []>} : vector<32x144xf32>, vector<144x72xf32>, vector<32x72xf32> -> vector<32x72xf32>
    %c2 = arith.constant 2 : index
    %c0_24 = arith.constant 0 : index
    %c0_25 = arith.constant 0 : index
    %19 = vector.load %arg6[%c2, %c0_24, %c0_25] : memref<3x144x72xf32, #tpu.memory_space<vmem>>, vector<1x144x72xf32>
    %20 = vector.shape_cast %19 : vector<1x144x72xf32> to vector<144x72xf32>
    %cst_26 = arith.constant dense<0.000000e+00> : vector<32x72xf32>
    %21 = tpu.matmul %7, %20, %cst_26 {dimension_numbers = #tpu.dot_dimension_numbers<[1], [0], [0], [1], [0, 0, 1, 1], [], []>} : vector<32x144xf32>, vector<144x72xf32>, vector<32x72xf32> -> vector<32x72xf32>
    %22 = vector.broadcast %10 : vector<1x72xf32> to vector<32x72xf32>
    %23 = arith.addf %22, %18 : vector<32x72xf32>
    %c1_i32 = arith.constant 1 : i32
    %24 = tpu.dynamic_rotate %15 by %c1_i32 dim 0 : vector<32x72xf32>, i32 -> vector<32x72xf32>
    %25 = vector.broadcast %8 : vector<32x1xf32> to vector<32x72xf32>
    %26 = arith.mulf %25, %24 : vector<32x72xf32>
    %27 = arith.addf %23, %26 : vector<32x72xf32>
    %c31_i32 = arith.constant 31 : i32
    %28 = tpu.dynamic_rotate %21 by %c31_i32 dim 0 : vector<32x72xf32>, i32 -> vector<32x72xf32>
    %29 = vector.broadcast %9 : vector<32x1xf32> to vector<32x72xf32>
    %30 = arith.mulf %29, %28 : vector<32x72xf32>
    %31 = arith.addf %27, %30 : vector<32x72xf32>
    %cst_27 = arith.constant dense<0.000000e+00> : vector<72xf32>
    %32 = vector.multi_reduction <add>, %31, %cst_27 [0] : vector<32x72xf32> to vector<72xf32>
    %33 = vector.shape_cast %32 : vector<72xf32> to vector<1x72xf32>
    %c0_28 = arith.constant 0 : index
    %c0_29 = arith.constant 0 : index
    %34 = vector.load %arg8[%c0_28, %c0_29] : memref<72x4xf32, #tpu.memory_space<vmem>>, vector<72x4xf32>
    %cst_30 = arith.constant dense<0.000000e+00> : vector<1x4xf32>
    %35 = tpu.matmul %33, %34, %cst_30 {dimension_numbers = #tpu.dot_dimension_numbers<[1], [0], [0], [1], [0, 0, 1, 1], [], []>} : vector<1x72xf32>, vector<72x4xf32>, vector<1x4xf32> -> vector<1x4xf32>
    %cst_31 = arith.constant 0.001953125 : f32
    %36 = vector.broadcast %cst_31 : f32 to vector<1x4xf32>
    %37 = arith.mulf %35, %36 : vector<1x4xf32>
    %c0_32 = arith.constant 0 : index
    %c0_33 = arith.constant 0 : index
    %38 = vector.load %arg9[%c0_32, %c0_33] : memref<4x72xf32, #tpu.memory_space<vmem>>, vector<4x72xf32>
    %cst_34 = arith.constant dense<0.000000e+00> : vector<1x72xf32>
    %39 = tpu.matmul %37, %38, %cst_34 {dimension_numbers = #tpu.dot_dimension_numbers<[1], [0], [0], [1], [0, 0, 1, 1], [], []>} : vector<1x4xf32>, vector<4x72xf32>, vector<1x72xf32> -> vector<1x72xf32>
    %40 = vector.broadcast %39 : vector<1x72xf32> to vector<32x72xf32>
    %41 = arith.subf %31, %40 : vector<32x72xf32>
    %42 = arith.mulf %41, %41 : vector<32x72xf32>
    %cst_35 = arith.constant dense<0.000000e+00> : vector<72xf32>
    %43 = vector.multi_reduction <add>, %42, %cst_35 [0] : vector<32x72xf32> to vector<72xf32>
    %44 = vector.shape_cast %43 : vector<72xf32> to vector<1x72xf32>
    %c0_36 = arith.constant 0 : index
    %c0_37 = arith.constant 0 : index
    %45 = vector.load %arg8[%c0_36, %c0_37] : memref<72x4xf32, #tpu.memory_space<vmem>>, vector<72x4xf32>
    %cst_38 = arith.constant dense<0.000000e+00> : vector<1x4xf32>
    %46 = tpu.matmul %44, %45, %cst_38 {dimension_numbers = #tpu.dot_dimension_numbers<[1], [0], [0], [1], [0, 0, 1, 1], [], []>} : vector<1x72xf32>, vector<72x4xf32>, vector<1x4xf32> -> vector<1x4xf32>
    %cst_39 = arith.constant 0.001953125 : f32
    %47 = vector.broadcast %cst_39 : f32 to vector<1x4xf32>
    %48 = arith.mulf %46, %47 : vector<1x4xf32>
    %c0_40 = arith.constant 0 : index
    %c0_41 = arith.constant 0 : index
    %49 = vector.load %arg9[%c0_40, %c0_41] : memref<4x72xf32, #tpu.memory_space<vmem>>, vector<4x72xf32>
    %cst_42 = arith.constant dense<0.000000e+00> : vector<1x72xf32>
    %50 = tpu.matmul %48, %49, %cst_42 {dimension_numbers = #tpu.dot_dimension_numbers<[1], [0], [0], [1], [0, 0, 1, 1], [], []>} : vector<1x4xf32>, vector<4x72xf32>, vector<1x72xf32> -> vector<1x72xf32>
    %cst_43 = arith.constant 9.99999974E-6 : f32
    %51 = vector.broadcast %cst_43 : f32 to vector<1x72xf32>
    %52 = arith.addf %50, %51 : vector<1x72xf32>
    %53 = math.rsqrt %52 : vector<1x72xf32>
    %54 = vector.broadcast %53 : vector<1x72xf32> to vector<32x72xf32>
    %55 = arith.mulf %41, %54 : vector<32x72xf32>
    %56 = vector.broadcast %11 : vector<1x72xf32> to vector<32x72xf32>
    %57 = arith.mulf %55, %56 : vector<32x72xf32>
    %58 = vector.broadcast %12 : vector<1x72xf32> to vector<32x72xf32>
    %59 = arith.addf %57, %58 : vector<32x72xf32>
    %cst_44 = arith.constant 0.000000e+00 : f32
    %60 = vector.broadcast %cst_44 : f32 to vector<32x72xf32>
    %61 = arith.maximumf %59, %60 : vector<32x72xf32>
    %c0_45 = arith.constant 0 : index
    %c0_46 = arith.constant 0 : index
    %62 = vector.load %arg13[%c0_45, %c0_46] : memref<1x64xf32, #tpu.memory_space<vmem>>, vector<1x64xf32>
    %c0_47 = arith.constant 0 : index
    %c0_48 = arith.constant 0 : index
    %63 = vector.load %arg16[%c0_47, %c0_48] : memref<1x64xf32, #tpu.memory_space<vmem>>, vector<1x64xf32>
    %c0_49 = arith.constant 0 : index
    %c0_50 = arith.constant 0 : index
    %64 = vector.load %arg17[%c0_49, %c0_50] : memref<1x64xf32, #tpu.memory_space<vmem>>, vector<1x64xf32>
    %c0_51 = arith.constant 0 : index
    %c0_52 = arith.constant 0 : index
    %c0_53 = arith.constant 0 : index
    %65 = vector.load %arg12[%c0_51, %c0_52, %c0_53] : memref<3x72x64xf32, #tpu.memory_space<vmem>>, vector<1x72x64xf32>
    %66 = vector.shape_cast %65 : vector<1x72x64xf32> to vector<72x64xf32>
    %cst_54 = arith.constant dense<0.000000e+00> : vector<32x64xf32>
    %67 = tpu.matmul %61, %66, %cst_54 {dimension_numbers = #tpu.dot_dimension_numbers<[1], [0], [0], [1], [0, 0, 1, 1], [], []>} : vector<32x72xf32>, vector<72x64xf32>, vector<32x64xf32> -> vector<32x64xf32>
    %c1_55 = arith.constant 1 : index
    %c0_56 = arith.constant 0 : index
    %c0_57 = arith.constant 0 : index
    %68 = vector.load %arg12[%c1_55, %c0_56, %c0_57] : memref<3x72x64xf32, #tpu.memory_space<vmem>>, vector<1x72x64xf32>
    %69 = vector.shape_cast %68 : vector<1x72x64xf32> to vector<72x64xf32>
    %cst_58 = arith.constant dense<0.000000e+00> : vector<32x64xf32>
    %70 = tpu.matmul %61, %69, %cst_58 {dimension_numbers = #tpu.dot_dimension_numbers<[1], [0], [0], [1], [0, 0, 1, 1], [], []>} : vector<32x72xf32>, vector<72x64xf32>, vector<32x64xf32> -> vector<32x64xf32>
    %c2_59 = arith.constant 2 : index
    %c0_60 = arith.constant 0 : index
    %c0_61 = arith.constant 0 : index
    %71 = vector.load %arg12[%c2_59, %c0_60, %c0_61] : memref<3x72x64xf32, #tpu.memory_space<vmem>>, vector<1x72x64xf32>
    %72 = vector.shape_cast %71 : vector<1x72x64xf32> to vector<72x64xf32>
    %cst_62 = arith.constant dense<0.000000e+00> : vector<32x64xf32>
    %73 = tpu.matmul %61, %72, %cst_62 {dimension_numbers = #tpu.dot_dimension_numbers<[1], [0], [0], [1], [0, 0, 1, 1], [], []>} : vector<32x72xf32>, vector<72x64xf32>, vector<32x64xf32> -> vector<32x64xf32>
    %74 = vector.broadcast %62 : vector<1x64xf32> to vector<32x64xf32>
    %75 = arith.addf %74, %70 : vector<32x64xf32>
    %c1_i32_63 = arith.constant 1 : i32
    %76 = tpu.dynamic_rotate %67 by %c1_i32_63 dim 0 : vector<32x64xf32>, i32 -> vector<32x64xf32>
    %77 = vector.broadcast %8 : vector<32x1xf32> to vector<32x64xf32>
    %78 = arith.mulf %77, %76 : vector<32x64xf32>
    %79 = arith.addf %75, %78 : vector<32x64xf32>
    %c31_i32_64 = arith.constant 31 : i32
    %80 = tpu.dynamic_rotate %73 by %c31_i32_64 dim 0 : vector<32x64xf32>, i32 -> vector<32x64xf32>
    %81 = vector.broadcast %9 : vector<32x1xf32> to vector<32x64xf32>
    %82 = arith.mulf %81, %80 : vector<32x64xf32>
    %83 = arith.addf %79, %82 : vector<32x64xf32>
    %cst_65 = arith.constant dense<0.000000e+00> : vector<64xf32>
    %84 = vector.multi_reduction <add>, %83, %cst_65 [0] : vector<32x64xf32> to vector<64xf32>
    %85 = vector.shape_cast %84 : vector<64xf32> to vector<1x64xf32>
    %c0_66 = arith.constant 0 : index
    %c0_67 = arith.constant 0 : index
    %86 = vector.load %arg14[%c0_66, %c0_67] : memref<64x4xf32, #tpu.memory_space<vmem>>, vector<64x4xf32>
    %cst_68 = arith.constant dense<0.000000e+00> : vector<1x4xf32>
    %87 = tpu.matmul %85, %86, %cst_68 {dimension_numbers = #tpu.dot_dimension_numbers<[1], [0], [0], [1], [0, 0, 1, 1], [], []>} : vector<1x64xf32>, vector<64x4xf32>, vector<1x4xf32> -> vector<1x4xf32>
    %cst_69 = arith.constant 0.001953125 : f32
    %88 = vector.broadcast %cst_69 : f32 to vector<1x4xf32>
    %89 = arith.mulf %87, %88 : vector<1x4xf32>
    %c0_70 = arith.constant 0 : index
    %c0_71 = arith.constant 0 : index
    %90 = vector.load %arg15[%c0_70, %c0_71] : memref<4x64xf32, #tpu.memory_space<vmem>>, vector<4x64xf32>
    %cst_72 = arith.constant dense<0.000000e+00> : vector<1x64xf32>
    %91 = tpu.matmul %89, %90, %cst_72 {dimension_numbers = #tpu.dot_dimension_numbers<[1], [0], [0], [1], [0, 0, 1, 1], [], []>} : vector<1x4xf32>, vector<4x64xf32>, vector<1x64xf32> -> vector<1x64xf32>
    %92 = vector.broadcast %91 : vector<1x64xf32> to vector<32x64xf32>
    %93 = arith.subf %83, %92 : vector<32x64xf32>
    %94 = arith.mulf %93, %93 : vector<32x64xf32>
    %cst_73 = arith.constant dense<0.000000e+00> : vector<64xf32>
    %95 = vector.multi_reduction <add>, %94, %cst_73 [0] : vector<32x64xf32> to vector<64xf32>
    %96 = vector.shape_cast %95 : vector<64xf32> to vector<1x64xf32>
    %c0_74 = arith.constant 0 : index
    %c0_75 = arith.constant 0 : index
    %97 = vector.load %arg14[%c0_74, %c0_75] : memref<64x4xf32, #tpu.memory_space<vmem>>, vector<64x4xf32>
    %cst_76 = arith.constant dense<0.000000e+00> : vector<1x4xf32>
    %98 = tpu.matmul %96, %97, %cst_76 {dimension_numbers = #tpu.dot_dimension_numbers<[1], [0], [0], [1], [0, 0, 1, 1], [], []>} : vector<1x64xf32>, vector<64x4xf32>, vector<1x4xf32> -> vector<1x4xf32>
    %cst_77 = arith.constant 0.001953125 : f32
    %99 = vector.broadcast %cst_77 : f32 to vector<1x4xf32>
    %100 = arith.mulf %98, %99 : vector<1x4xf32>
    %c0_78 = arith.constant 0 : index
    %c0_79 = arith.constant 0 : index
    %101 = vector.load %arg15[%c0_78, %c0_79] : memref<4x64xf32, #tpu.memory_space<vmem>>, vector<4x64xf32>
    %cst_80 = arith.constant dense<0.000000e+00> : vector<1x64xf32>
    %102 = tpu.matmul %100, %101, %cst_80 {dimension_numbers = #tpu.dot_dimension_numbers<[1], [0], [0], [1], [0, 0, 1, 1], [], []>} : vector<1x4xf32>, vector<4x64xf32>, vector<1x64xf32> -> vector<1x64xf32>
    %cst_81 = arith.constant 9.99999974E-6 : f32
    %103 = vector.broadcast %cst_81 : f32 to vector<1x64xf32>
    %104 = arith.addf %102, %103 : vector<1x64xf32>
    %105 = math.rsqrt %104 : vector<1x64xf32>
    %106 = vector.broadcast %105 : vector<1x64xf32> to vector<32x64xf32>
    %107 = arith.mulf %93, %106 : vector<32x64xf32>
    %108 = vector.broadcast %63 : vector<1x64xf32> to vector<32x64xf32>
    %109 = arith.mulf %107, %108 : vector<32x64xf32>
    %110 = vector.broadcast %64 : vector<1x64xf32> to vector<32x64xf32>
    %111 = arith.addf %109, %110 : vector<32x64xf32>
    %cst_82 = arith.constant 0.000000e+00 : f32
    %112 = vector.broadcast %cst_82 : f32 to vector<32x64xf32>
    %113 = arith.maximumf %111, %112 : vector<32x64xf32>
    %c0_83 = arith.constant 0 : index
    %c0_84 = arith.constant 0 : index
    %114 = vector.load %arg18[%c0_83, %c0_84] : memref<32x64xf32, #tpu.memory_space<vmem>>, vector<32x64xf32>
    tpu.vector_store %arg18[%c0_83, %c0_84], %113 {strides = array<i32>} : memref<32x64xf32, #tpu.memory_space<vmem>>, vector<32x64xf32>,
    return
  }
}

</mosaic_0001>

<bundles_post_ra>
// kernel: decoder_block_forward.1
= control target key start
LH: loop header
LB: loop body
LE: loop exit
PB: predicated region body
PF: predicated region fallthrough
CT: control target
= control target key end

     0   :  { %v2321_v3 = vmov 0.0   ;;  %v2322_v4 = vmov 0.0|0.0   ;;  %vm249_vm0 = vcmask 130048   ;;  %vm2324_vm1 = vmmov 0   ;;  %s3170_s2 = inlined_call_operand.vmem [shape: f32[128,144], index: 2, kind: input, shape index: {}]   ;;  %s3171_s6 = inlined_call_operand.vmem [shape: f32[3,144,72], index: 6, kind: input, shape index: {}]   ;;  %s3172_s0 = inlined_call_operand.vmem [shape: f32[32,128], index: 0, kind: input, shape index: {}]   ;;  %s3173_s4 = inlined_call_operand.vmem [shape: f32[32,1], index: 4, kind: input, shape index: {}]   ;;  %s3174_s5 = inlined_call_operand.vmem [shape: f32[32,1], index: 5, kind: input, shape index: {}]   ;;  %s3175_s3 = inlined_call_operand.vmem [shape: f32[1,144], index: 3, kind: input, shape index: {}]   ;;  %s3176_s1 = inlined_call_operand.vmem [shape: f32[32,144], index: 1, kind: input, shape index: {}]   ;;  %s3177_s8 = inlined_call_operand.vmem [shape: f32[72,4], index: 8, kind: input, shape index: {}]   ;;  %s3178_s9 = inlined_call_operand.vmem [shape: f32[4,72], index: 9, kind: input, shape index: {}]   ;;  %s3179_s7 = inlined_call_operand.vmem [shape: f32[1,72], index: 7, kind: input, shape index: {}]   ;;  %s3180_s12 = inlined_call_operand.vmem [shape: f32[3,72,64], index: 12, kind: input, shape index: {}]   ;;  %s3181_s10 = inlined_call_operand.vmem [shape: f32[1,72], index: 10, kind: input, shape index: {}]   ;;  %s3182_s11 = inlined_call_operand.vmem [shape: f32[1,72], index: 11, kind: input, shape index: {}]   ;;  %s3183_s14 = inlined_call_operand.vmem [shape: f32[64,4], index: 14, kind: input, shape index: {}]   ;;  %s3184_s13 = inlined_call_operand.vmem [shape: f32[1,64], index: 13, kind: input, shape index: {}]   ;;  %s3185_s15 = inlined_call_operand.vmem [shape: f32[4,64], index: 15, kind: input, shape index: {}]   ;;  %s3186_s16 = inlined_call_operand.vmem [shape: f32[1,64], index: 16, kind: input, shape index: {}]   ;;  %s3187_s17 = inlined_call_operand.vmem [shape: f32[1,64], index: 17, kind: input, shape index: {}]   ;;  %s3188_s18 = inlined_call_operand.vmem [shape: f32[32,64], index: 18, kind: output, shape index: {}]  }
   0x1   :  { %3192 = sst [smem:[#allocation2_spill]] %s3170_s2  ;;  %187 = vmatprep.mubr.f32.mxu0 %v2321_v3  ;;  %2134 = vmatprep.subr.bf16.mxu1 %v2322_v4  ;;  %vm743_vm2 = vcmask 1043456   ;;  %vm641_vm5 = vcmask 588800   ;;  %vm739_vm6 = vcmask 31744   ;;  %vm1363_vm7 = vcmask 523264  }
   0x2   :  { %3193 = sst [smem:[#allocation3_spill]] %s3171_s6  ;;  %s3195_s29 = sld [smem:[#allocation2_spill]] }
   0x3   :  { %3194 = sst [smem:[#allocation4_spill]] %s3172_s0  ;;  %s3196_s25 = sld [smem:[#allocation3_spill]] }
   0x4   :  { %s3197_s27 = sld [smem:[#allocation4_spill]] }
   0x8   :  { %v92_v0 = vld [vmem:[%s3195_s29 + $0x8] sm:$0xff]  ;;  %v94_v1 = vld [vmem:[%s3195_s29 + $0x18] sm:$0xff]  ;;  %v91_v2 = vld [vmem:[%s3195_s29] sm:$0xff] }
   0x9   :  { %v2102_v5 = vpack.c.bf16 %v94_v1, %v92_v0  ;;  %v93_v6 = vld [vmem:[%s3195_s29 + $0x10] sm:$0xff]  ;;  %v96_v7 = vld [vmem:[%s3195_s29 + $0x28] sm:$0xff]  ;;  %v98_v8 = vld [vmem:[%s3195_s29 + $0x38] sm:$0xff] }
   0xa   :  { %v2104_v9 = vpack.c.bf16 %v93_v6, %v91_v2  ;;  %v2106_v10 = vpack.c.bf16 %v98_v8, %v96_v7  ;;  %v95_v11 = vld [vmem:[%s3195_s29 + $0x20] sm:$0xff]  ;;  %v97_v12 = vld [vmem:[%s3195_s29 + $0x30] sm:$0xff]  ;;  %v100_v13 = vld [vmem:[%s3195_s29 + $0x48] sm:$0xff] }
   0xb   :  { %2103 = vmatprep.subr.bf16.mxu0 %v2102_v5  ;;  %v102_v14 = vld [vmem:[%s3195_s29 + $0x58] sm:$0xff]  ;;  %v2108_v15 = vpack.c.bf16 %v97_v12, %v95_v11  ;;  %v99_v17 = vld [vmem:[%s3195_s29 + $0x40] sm:$0xff]  ;;  %v101_v18 = vld [vmem:[%s3195_s29 + $0x50] sm:$0xff] }
   0xc   :  { %2105 = vmatpush1.bf16.msra.mxu0 %v2104_v9  ;;  %v2110_v16 = vpack.c.bf16 %v102_v14, %v100_v13  ;;  %v104_v19 = vld [vmem:[%s3195_s29 + $0x68] sm:$0xff]  ;;  %v106_v20 = vld [vmem:[%s3195_s29 + $0x78] sm:$0xff]  ;;  %v2112_v21 = vpack.c.bf16 %v101_v18, %v99_v17  ;;  %v103_v23 = vld [vmem:[%s3195_s29 + $0x60] sm:$0xff] }
   0xd   :  { %2107 = vmatprep.subr.bf16.mxu0 %v2106_v10  ;;  %v2114_v22 = vpack.c.bf16 %v106_v20, %v104_v19  ;;  %v105_v24 = vld [vmem:[%s3195_s29 + $0x70] sm:$0xff]  ;;  %v108_v25 = vld [vmem:[%s3195_s29 + $0x88] sm:$0xff]  ;;  %v110_v26 = vld [vmem:[%s3195_s29 + $0x98] sm:$0xff] }
   0xe   :  { %v2116_v27 = vpack.c.bf16 %v105_v24, %v103_v23  ;;  %v107_v28 = vld [vmem:[%s3195_s29 + $0x80] sm:$0xff]  ;;  %v232_v30 = vld [vmem:[%s3196_s25 + $0x8] sm:$0xff]  ;;  %v2118_v31 = vpack.c.bf16 %v110_v26, %v108_v25  ;;  %v109_v32 = vld [vmem:[%s3195_s29 + $0x90] sm:$0xff] }
   0xf   :  { %v231_v29 = vld [vmem:[%s3196_s25] sm:$0xff]  ;;  %v233_v34 = vld [vmem:[%s3196_s25 + $0x10] sm:$0xff]  ;;  %v234_v35 = vld [vmem:[%s3196_s25 + $0x18] sm:$0xff]  ;;  %v2120_v39 = vpack.c.bf16 %v109_v32, %v107_v28 }
  0x10   :  { %2109 = vmatpush1.bf16.msra.mxu0 %v2108_v15  ;;  %v2135_v33 = vpack.c.bf16 %v232_v30, %v231_v29  ;;  %v112_v36 = vld [vmem:[%s3195_s29 + $0xa8] sm:$0xff]  ;;  %v114_v37 = vld [vmem:[%s3195_s29 + $0xb8] sm:$0xff]  ;;  %v2138_v38 = vpack.c.bf16 %v234_v35, %v233_v34  ;;  %v235_v40 = vld [vmem:[%s3196_s25 + $0x20] sm:$0xff] }
  0x11   :  { %2111 = vmatprep.subr.bf16.mxu0 %v2110_v16  ;;  %v236_v41 = vld [vmem:[%s3196_s25 + $0x28] sm:$0xff]  ;;  %v2122_v42 = vpack.c.bf16 %v114_v37, %v112_v36  ;;  %v111_v43 = vld [vmem:[%s3195_s29 + $0xa0] sm:$0xff]  ;;  %v113_v44 = vld [vmem:[%s3195_s29 + $0xb0] sm:$0xff] }
  0x12   :  { %2136 = vmatpush1.bf16.msra.mxu1 %v2135_v33  ;;  %v116_v45 = vld [vmem:[%s3195_s29 + $0xc8] sm:$0xff]  ;;  %v118_v46 = vld [vmem:[%s3195_s29 + $0xd8] sm:$0xff]  ;;  %v2141_v47 = vpack.c.bf16 %v236_v41, %v235_v40  ;;  %v2124_v48 = vpack.c.bf16 %v113_v44, %v111_v43  ;;  %v237_v49 = vld [vmem:[%s3196_s25 + $0x30] sm:$0xff] }
  0x13   :  { %2137 = vmatprep.subr.bf16.mxu1 %v2322_v4  ;;  %v238_v50 = vld [vmem:[%s3196_s25 + $0x38] sm:$0xff]  ;;  %v2126_v51 = vpack.c.bf16 %v118_v46, %v116_v45  ;;  %v115_v52 = vld [vmem:[%s3195_s29 + $0xc0] sm:$0xff]  ;;  %v117_v53 = vld [vmem:[%s3195_s29 + $0xd0] sm:$0xff]  ;;  %v2323_v46 = vmov 0  }
  0x14   :  { %2113 = vmatpush1.bf16.msra.mxu0 %v2112_v21  ;;  %v120_v54 = vld [vmem:[%s3195_s29 + $0xe8] sm:$0xff]  ;;  %v122_v55 = vld [vmem:[%s3195_s29 + $0xf8] sm:$0xff]  ;;  %v2144_v56 = vpack.c.bf16 %v238_v50, %v237_v49  ;;  %v2128_v57 = vpack.c.bf16 %v117_v53, %v115_v52  ;;  %v239_v58 = vld [vmem:[%s3196_s25 + $0x40] sm:$0xff]  ;;  %2315 = vset.pattern.permute.xlu0 %v2323_v46 }
  0x15   :  { %2115 = vmatprep.subr.bf16.mxu0 %v2114_v22  ;;  %v240_v59 = vld [vmem:[%s3196_s25 + $0x48] sm:$0xff]  ;;  %v2130_v60 = vpack.c.bf16 %v122_v55, %v120_v54  ;;  %v119_v61 = vld [vmem:[%s3195_s29 + $0xe0] sm:$0xff]  ;;  %v121_v62 = vld [vmem:[%s3195_s29 + $0xf0] sm:$0xff]  ;;  %2316 = vset.pattern.permute.xlu1 %v2323_v46  ;;  %v69_v55 = vlaneseq }
  0x16   :  { %2139 = vmatpush1.bf16.msra.mxu1 %v2138_v38  ;;  %v2147_v63 = vpack.c.bf16 %v240_v59, %v239_v58  ;;  %v2132_v0 = vpack.c.bf16 %v121_v62, %v119_v61  ;;  %v241_v1 = vld [vmem:[%s3196_s25 + $0x50] sm:$0xff]  ;;  %v242_v2 = vld [vmem:[%s3196_s25 + $0x58] sm:$0xff]  ;;  %v87_v8 = vld [vmem:[%s3197_s27] sm:$0xff] }
  0x17   :  { %2140 = vmatprep.subr.bf16.mxu1 %v2322_v4  ;;  %v1753_v5 = vld [vmem:[%s3196_s25 + $0x90] sm:$0xff]  ;;  %v1754_v6 = vld [vmem:[%s3196_s25 + $0x98] sm:$0xff]  ;;  %v2150_v7 = vpack.c.bf16 %v242_v2, %v241_v1  ;;  %v243_v10 = vld [vmem:[%s3196_s25 + $0x60] sm:$0xff] }
  0x18   :  { %2117 = vmatpush1.bf16.msra.mxu0 %v2116_v27  ;;  %v2162_v9 = vpack.c.bf16 %v1754_v6, %v1753_v5  ;;  %v244_v11 = vld [vmem:[%s3196_s25 + $0x68] sm:$0xff]  ;;  %v1755_v12 = vld [vmem:[%s3196_s25 + $0xa0] sm:$0xff]  ;;  %v245_v17 = vld [vmem:[%s3196_s25 + $0x70] sm:$0xff] }
  0x19   :  { %2119 = vmatprep.subr.bf16.mxu0 %v2118_v31  ;;  %v1756_v13 = vld [vmem:[%s3196_s25 + $0xa8] sm:$0xff]  ;;  %v2153_v14 = vpack.c.bf16 %v244_v11, %v243_v10  ;;  %v246_v18 = vld [vmem:[%s3196_s25 + $0x78] sm:$0xff]  ;;  %v1757_v19 = vld [vmem:[%s3196_s25 + $0xb0] sm:$0xff] }
  0x1a   :  { %2142 = vmatpush1.bf16.msra.mxu1 %v2141_v47  ;;  %v88_v15 = vld [vmem:[%s3197_s27 + $0x8] sm:$0xff]  ;;  %v2165_v16 = vpack.c.bf16 %v1756_v13, %v1755_v12  ;;  %v1758_v20 = vld [vmem:[%s3196_s25 + $0xb8] sm:$0xff]  ;;  %v2156_v21 = vpack.c.bf16 %v246_v18, %v245_v17  ;;  %v89_v22 = vld [vmem:[%s3197_s27 + $0x10] sm:$0xff] }
  0x1b   :  { %2143 = vmatprep.subr.bf16.mxu1 %v2322_v4  ;;  %v2168_v23 = vpack.c.bf16 %v1758_v20, %v1757_v19  ;;  %v1759_v24 = vld [vmem:[%s3196_s25 + $0xc0] sm:$0xff]  ;;  %v1760_v25 = vld [vmem:[%s3196_s25 + $0xc8] sm:$0xff]  ;;  %v90_v26 = vld [vmem:[%s3197_s27 + $0x18] sm:$0xff] }
  0x1c   :  { %2121 = vmatpush1.bf16.msra.mxu0 %v2120_v39  ;;  %v2171_v27 = vpack.c.bf16 %v1760_v25, %v1759_v24  ;;  %v1761_v28 = vld [vmem:[%s3196_s25 + $0xd0] sm:$0xff]  ;;  %v1762_v29 = vld [vmem:[%s3196_s25 + $0xd8] sm:$0xff]  ;;  %v1763_v31 = vld [vmem:[%s3196_s25 + $0xe0] sm:$0xff] }
  0x1d   :  { %2123 = vmatprep.subr.bf16.mxu0 %v2122_v42  ;;  %v2174_v30 = vpack.c.bf16 %v1762_v29, %v1761_v28  ;;  %v1764_v32 = vld [vmem:[%s3196_s25 + $0xe8] sm:$0xff]  ;;  %v1765_v34 = vld [vmem:[%s3196_s25 + $0xf0] sm:$0xff]  ;;  %v1766_v35 = vld [vmem:[%s3196_s25 + $0xf8] sm:$0xff] }
  0x1e   :  { %2145 = vmatpush1.bf16.msra.mxu1 %v2144_v56  ;;  %v2177_v33 = vpack.c.bf16 %v1764_v32, %v1763_v31  ;;  %v2180_v36 = vpack.c.bf16 %v1766_v35, %v1765_v34  ;;  %v1767_v37 = vld [vmem:[%s3196_s25 + $0x100] sm:$0xff]  ;;  %v1768_v38 = vld [vmem:[%s3196_s25 + $0x108] sm:$0xff]  ;;  %v1769_v43 = vld [vmem:[%s3196_s25 + $0x110] sm:$0xff]  ;;  %v2684_v56 = vshrl.u32 %v69_v55, 7 }
  0x1f   :  { %2146 = vmatprep.subr.bf16.mxu1 %v2322_v4  ;;  %v2183_v39 = vpack.c.bf16 %v1768_v38, %v1767_v37  ;;  %v247_v40 = vld [vmem:[%s3196_s25 + $0x80] sm:$0xff]  ;;  %v248_v41 = vld [vmem:[%s3196_s25 + $0x88] sm:$0xff]  ;;  %v1770_v44 = vld [vmem:[%s3196_s25 + $0x118] sm:$0xff] }
  0x20   :  { %2125 = vmatpush1.bf16.msra.mxu0 %v2124_v48  ;;  %v2159_v42 = vpack.c.bf16 %v248_v41, %v247_v40  ;;  %v2186_v45 = vpack.c.bf16 %v1770_v44, %v1769_v43  ;;  %v220_v47 = vld [vmem:[%s3173_s4] sm:$0xff]  ;;  %v222_v48 = vld [vmem:[%s3173_s4 + $0x10] sm:$0xff]  ;;  %v221_v49 = vld [vmem:[%s3173_s4 + $0x8] sm:$0xff]  ;;  %v2691_v59 = vsub.s32 0, %v2684_v56  ;;  %vm571_vm3 = vcmp.lt.s32.totalorder %v2684_v56, 1 }
  0x21   :  { %2127 = vmatprep.subr.bf16.mxu0 %v2126_v51  ;;  %578 = vperm.xlu0 %2315, %v220_v47   ;;  %v224_v50 = vld [vmem:[%s3174_s5] sm:$0xff]  ;;  %v223_v51 = vld [vmem:[%s3173_s4 + $0x18] sm:$0xff]  ;;  %v225_v52 = vld [vmem:[%s3174_s5 + $0x8] sm:$0xff]  ;;  %vm608_vm4 = vcmp.lt.s32.totalorder %v2684_v56, 7 }
  0x22   :  { %2148 = vmatpush1.bf16.msra.mxu1 %v2147_v63  ;;  %588 = vperm.xlu1 %2316, %v222_v48   ;;  %v226_v53 = vld [vmem:[%s3174_s5 + $0x10] sm:$0xff]  ;;  %v227_v54 = vld [vmem:[%s3174_s5 + $0x18] sm:$0xff]  ;;  %v67_v58 = vld [vmem:[%s3175_s3] sm:$0x3] }
  0x23   :  { %2149 = vmatprep.subr.bf16.mxu1 %v2322_v4  ;;  %v72_v61 = vrot.slane %v67_v58, %v2691_v59  ;;  %v60_v62 = vld [vmem:[%s3176_s1 + $0x8] sm:$0xff]  ;;  %v59_v63 = vld [vmem:[%s3176_s1] sm:$0xff]  ;;  %v61_v1 = vld [vmem:[%s3176_s1 + $0x10] sm:$0xff] }
  0x24   :  { %2129 = vmatpush1.bf16.msra.mxu0 %v2128_v57  ;;  %v75_v57 = vsub.s32 1, %v2684_v56  ;;  %v62_v5 = vld [vmem:[%s3176_s1 + $0x18] sm:$0xff]  ;;  %v1775_v6 = vld [vmem:[%s3196_s25 + $0x120] sm:$0xff]  ;;  %v1777_v17 = vld [vmem:[%s3196_s25 + $0x130] sm:$0xff] }
  0x25   :  { %2131 = vmatprep.subr.bf16.mxu0 %v2130_v60  ;;  %583 = vperm.xlu0 %2315, %v221_v49   ;;  %v79_v2 = vadd.f32 %v72_v61, %v59_v63  ;;  %v81_v10 = vadd.f32 %v72_v61, %v61_v1  ;;  %v1778_v18 = vld [vmem:[%s3196_s25 + $0x138] sm:$0xff]  ;;  %v1779_v28 = vld [vmem:[%s3196_s25 + $0x140] sm:$0xff]  ;;  %v1780_v29 = vld [vmem:[%s3196_s25 + $0x148] sm:$0xff] }
  0x26   :  { %2151 = vmatpush1.bf16.msra.mxu1 %v2150_v7  ;;  %615 = vperm.xlu1 %2316, %v224_v50   ;;  %v76_v60 = vrot.slane %v67_v58, %v75_v57  ;;  %v1776_v7 = vld [vmem:[%s3196_s25 + $0x128] sm:$0xff]  ;;  %v2192_v25 = vpack.c.bf16 %v1778_v18, %v1777_v17  ;;  %v1781_v37 = vld [vmem:[%s3196_s25 + $0x150] sm:$0xff]  ;;  %v1782_v38 = vld [vmem:[%s3196_s25 + $0x158] sm:$0xff] }
  0x27   :  { %2152 = vmatprep.subr.bf16.mxu1 %v2322_v4  ;;  %v2189_v13 = vpack.c.bf16 %v1776_v7, %v1775_v6  ;;  %v2198_v43 = vpack.c.bf16 %v1782_v38, %v1781_v37  ;;  %v1783_v44 = vld [vmem:[%s3196_s25 + $0x160] sm:$0xff]  ;;  %v1785_v47 = vld [vmem:[%s3196_s25 + $0x170] sm:$0xff]  ;;  %v1786_v48 = vld [vmem:[%s3196_s25 + $0x178] sm:$0xff] }
  0x28   :  { %2133 = vmatpush1.bf16.msra.mxu0 %v2132_v0  ;;  %v80_v0 = vadd.f32 %v76_v60, %v60_v62  ;;  %v82_v12 = vadd.f32 %v76_v60, %v62_v5  ;;  %v2204_v49 = vpack.c.bf16 %v1786_v48, %v1785_v47  ;;  %v1787_v50 = vld [vmem:[%s3196_s25 + $0x180] sm:$0xff]  ;;  %v1792_v58 = vld [vmem:[%s3196_s25 + $0x1a8] sm:$0xff]  ;;  %v658_v1 = vld [vmem:[%s3177_s8 + $0x18] sm:$0xff] }
  0x29   :  { %2161 = vmatprep.subr.bf16.mxu0 %v2322_v4  ;;  %620 = vperm.xlu0 %2315, %v225_v52   ;;  %v1791_v57 = vld [vmem:[%s3196_s25 + $0x1a0] sm:$0xff]  ;;  %v656_v62 = vld [vmem:[%s3177_s8 + $0x8] sm:$0xff] }
  0x2a   :  { %2154 = vmatpush1.bf16.msra.mxu1 %v2153_v14  ;;  %593 = vperm.xlu1 %2316, %v223_v51   ;;  %v63_v14 = vld [vmem:[%s3176_s1 + $0x20] sm:$0xff]  ;;  %v1788_v51 = vld [vmem:[%s3196_s25 + $0x188] sm:$0xff] }
  0x2b   :  { %188 = vmatmul.mubr.f32.vlgmr.msra.gmra.mrb[0].mxu0 %v87_v8  ;;  %2155 = vmatprep.subr.bf16.mxu1 %v2322_v4  ;;  %v2207_v52 = vpack.c.bf16 %v1788_v51, %v1787_v50  ;;  %v659_v5 = vld [vmem:[%s3177_s8 + $0x20] sm:$0xff]  ;;  %v660_v6 = vld [vmem:[%s3177_s8 + $0x28] sm:$0xff] }
  0x2c   :  { %193 = vmatprep.mubr.f32.mxu0 %v2321_v3  ;;  %2163 = vmatpush1.bf16.msra.mxu0 %v2162_v9  ;;  %v2834_v7 = vpack.c.bf16 %v660_v6, %v659_v5 }
  0x2d   :  { %2164 = vmatprep.subr.bf16.mxu0 %v2322_v4  ;;  %625 = vperm.xlu0 %2315, %v226_v53   ;;  %v1789_v53 = vld [vmem:[%s3196_s25 + $0x190] sm:$0xff] }
  0x2e   :  { %2157 = vmatpush1.bf16.msra.mxu1 %v2156_v21  ;;  %630 = vperm.xlu1 %2316, %v227_v54   ;;  %v1790_v54 = vld [vmem:[%s3196_s25 + $0x198] sm:$0xff] }
  0x2f   :  { %194 = vmatmul.mubr.f32.gmra.mrb[2].mxu0 %v88_v15  ;;  %2158 = vmatprep.subr.bf16.mxu1 %v2322_v4  ;;  %v2210_v55 = vpack.c.bf16 %v1790_v54, %v1789_v53 }
  0x30   :  { %199 = vmatprep.mubr.f32.mxu0 %v2321_v3  ;;  %2166 = vmatpush1.bf16.msra.mxu0 %v2165_v16  ;;  %v64_v16 = vld [vmem:[%s3176_s1 + $0x28] sm:$0xff] }
  0x31   :  { %2167 = vmatprep.subr.bf16.mxu0 %v2322_v4  ;;  %v84_v24 = vadd.f32 %v76_v60, %v64_v16 }
  0x32   :  { %2160 = vmatpush1.bf16.msra.mxu1 %v2159_v42 }
  0x33   :  { %200 = vmatmul.mubr.f32.gmra.mrb[4].mxu0 %v89_v22  ;;  %2188 = vmatprep.subr.bf16.mxu1 %v2322_v4  ;;  %v83_v22 = vadd.f32 %v72_v61, %v63_v14 }
  0x34   :  { %205 = vmatprep.mubr.f32.mxu0 %v2321_v3  ;;  %2169 = vmatpush1.bf16.msra.mxu0 %v2168_v23 }
  0x35   :  { %2170 = vmatprep.subr.bf16.mxu0 %v2322_v4 }
  0x37   :  { %206 = vmatmul.mubr.f32.gmra.mrb[6].mxu0 %v90_v26  ;;  %v65_v26 = vld [vmem:[%s3176_s1 + $0x30] sm:$0xff] }
  0x38   :  { %2172 = vmatpush1.bf16.msra.mxu0 %v2171_v27  ;;  %v66_v27 = vld [vmem:[%s3176_s1 + $0x38] sm:$0xff] }
  0x39   :  { %2173 = vmatprep.subr.bf16.mxu0 %v2322_v4  ;;  %v86_v35 = vadd.f32 %v76_v60, %v66_v27  ;;  %v2213_v60 = vpack.c.bf16 %v1792_v58, %v1791_v57 }
  0x3c   :  { %2175 = vmatpush1.bf16.msra.mxu0 %v2174_v30 }
  0x3d   :  { %2176 = vmatprep.subr.bf16.mxu0 %v2322_v4 }
  0x40   :  { %2178 = vmatpush1.bf16.msra.mxu0 %v2177_v33  ;;  %v85_v33 = vadd.f32 %v72_v61, %v65_v26  ;;  %v655_v61 = vld [vmem:[%s3177_s8] sm:$0xff] }
  0x41   :  { %2179 = vmatprep.subr.bf16.mxu0 %v2322_v4  ;;  %v2814_v63 = vpack.c.bf16 %v656_v62, %v655_v61 }
  0x44   :  { %2181 = vmatpush1.bf16.msra.mxu0 %v2180_v36  ;;  %v2195_v36 = vpack.c.bf16 %v1780_v29, %v1779_v28 }
  0x45   :  { %2182 = vmatprep.subr.bf16.mxu0 %v2322_v4 }
  0x48   :  { %2184 = vmatpush1.bf16.msra.mxu0 %v2183_v39 }
  0x49   :  { %2185 = vmatprep.subr.bf16.mxu0 %v2322_v4 }
  0x4c   :  { %2187 = vmatpush1.bf16.msra.mxu0 %v2186_v45  ;;  %v1784_v45 = vld [vmem:[%s3196_s25 + $0x168] sm:$0xff] }
  0x4d   :  { %2215 = vmatprep.subr.bf16.mxu0 %v2322_v4  ;;  %v2201_v46 = vpack.c.bf16 %v1784_v45, %v1783_v44 }
  0xa1   :  { %v2869_v14 = vpop.permute.xlu1 %588 }
  0xfe   :  { %v189_v8 = vpop.f32.mrb[0].mxu0 }
  0xff   :  { %v191_v9 = vpop.f32.mrb[1].mxu0  ;;  %v2715_v15 = vadd.f32 %v189_v8, %v79_v2  ;;  %v661_v8 = vld [vmem:[%s3177_s8 + $0x30] sm:$0xff] }
 0x100   :  { %v213_v11 = vadd.f32 %v191_v9, %v80_v0  ;;  %v657_v0 = vld [vmem:[%s3177_s8 + $0x10] sm:$0xff]  ;;  %v662_v9 = vld [vmem:[%s3177_s8 + $0x38] sm:$0xff] }
 0x101   :  { %v2824_v2 = vpack.c.bf16 %v658_v1, %v657_v0 }
 0x102   :  { %v195_v19 = vpop.f32.mrb[2].mxu0  ;;  %1749 = vmatprep.mubr.msk.f32.mxu1 %vm249_vm0, %v213_v11  ;;  %1771 = vmatprep.mubr.msk.f32.mxu0 %vm249_vm0, %v213_v11 }
 0x103   :  { %v2728_v20 = vadd.f32 %v195_v19, %v81_v10  ;;  %v197_v21 = vpop.f32.mrb[3].mxu0  ;;  %327 = vmatmul.mubr.f32.vlgmr.msra.gmra.mrb[0].mxu1 %v2715_v15  ;;  %431 = vmatmul.mubr.f32.vlgmr.msra.gmra.mrb[8].mxu0 %v2715_v15  ;;  %v2844_v10 = vpack.c.bf16 %v662_v9, %v661_v8 }
 0x104   :  { %v2732_v23 = vadd.f32 %v197_v21, %v82_v12  ;;  %2190 = vmatpush1.bf16.msra.mxu1 %v2189_v13  ;;  %2217 = vmatpush3.bf16.msra.mxu0 %v2814_v63  ;;  %v2862_v12 = vld [vmem:[%s3178_s9] sm:$0xf]  ;;  %v2867_v13 = vpop.permute.xlu0 %578 }
 0x105   :  { %2191 = vmatprep.subr.bf16.mxu1 %v2322_v4  ;;  %2218 = vmatprep.subr.bf16.mxu0 %v2322_v4 }
 0x106   :  { %v201_v30 = vpop.f32.mrb[4].mxu0  ;;  %1750 = vmatprep.mubr.msk.f32.mxu1 %vm249_vm0, %v2732_v23  ;;  %1772 = vmatprep.mubr.msk.f32.mxu0 %vm249_vm0, %v2732_v23 }
 0x107   :  { %v216_v31 = vadd.f32 %v201_v30, %v83_v22  ;;  %v203_v32 = vpop.f32.mrb[5].mxu0  ;;  %332 = vmatmul.mubr.f32.gmra.mrb[2].mxu1 %v2728_v20  ;;  %436 = vmatmul.mubr.f32.gmra.mrb[10].mxu0 %v2728_v20 }
 0x108   :  { %v217_v34 = vadd.f32 %v203_v32, %v84_v24  ;;  %2193 = vmatpush1.bf16.msra.mxu1 %v2192_v25  ;;  %2220 = vmatpush3.bf16.msra.mxu0 %v2824_v2  ;;  %v2871_v19 = vpop.permute.xlu0 %583  ;;  %v1797_v24 = vld [vmem:[%s3179_s7] ss:$0 sm:$0xff] }
 0x109   :  { %2194 = vmatprep.subr.bf16.mxu1 %v2322_v4  ;;  %2221 = vmatprep.subr.bf16.mxu0 %v2322_v4 }
 0x10a   :  { %v207_v39 = vpop.f32.mrb[6].mxu0  ;;  %1751 = vmatprep.mubr.msk.f32.mxu1 %vm249_vm0, %v217_v34  ;;  %1773 = vmatprep.mubr.msk.f32.mxu0 %vm249_vm0, %v217_v34 }
 0x10b   :  { %v218_v40 = vadd.f32 %v207_v39, %v85_v33  ;;  %v209_v41 = vpop.f32.mrb[7].mxu0  ;;  %337 = vmatmul.mubr.f32.gmra.mrb[4].mxu1 %v216_v31  ;;  %441 = vmatmul.mubr.f32.gmra.mrb[12].mxu0 %v216_v31 }
 0x10c   :  { %v219_v42 = vadd.f32 %v209_v41, %v86_v35  ;;  %2196 = vmatpush1.bf16.msra.mxu1 %v2195_v36  ;;  %2223 = vmatpush3.bf16.msra.mxu0 %v2834_v7  ;;  %v2897_v6 = vpop.permute.xlu0 %620 }
 0x10d   :  { %2197 = vmatprep.subr.bf16.mxu1 %v2322_v4  ;;  %2224 = vmatprep.subr.bf16.mxu0 %v2322_v4 }
 0x10e   :  { %1752 = vmatprep.mubr.msk.f32.mxu1 %vm249_vm0, %v219_v42  ;;  %1774 = vmatprep.mubr.msk.f32.mxu0 %vm249_vm0, %v219_v42 }
 0x10f   :  { %342 = vmatmul.mubr.f32.gmra.mrb[6].mxu1 %v218_v40  ;;  %446 = vmatmul.mubr.f32.gmra.mrb[14].mxu0 %v218_v40 }
 0x110   :  { %2199 = vmatpush1.bf16.msra.mxu1 %v2198_v43  ;;  %1793 = vmatprep.mubr.msk.f32.mxu1 %vm249_vm0, %v213_v11  ;;  %v2851_v11 = vld [vmem:[%s3177_s8 + $0x40] sm:$0xff] }
 0x111   :  { %2200 = vmatprep.subr.bf16.mxu1 %v2322_v4  ;;  %2226 = vmatpush3.bf16.msra.mxu0 %v2844_v10 }
 0x112   :  { %1946 = vmatprep.subr.mxu0 %v2321_v3  ;;  %1948 = vmatprep.mubr.msk.f32.mxu0 %vm2324_vm1, %v2321_v3 }
 0x114   :  { %2202 = vmatpush1.bf16.msra.mxu1 %v2201_v46 }
 0x115   :  { %2203 = vmatprep.subr.bf16.mxu1 %v2322_v4  ;;  %1947 = vmatpush3.msra.mxu0 %v2851_v11 }
 0x116   :  { %2227 = vmatprep.subr.bf16.mxu0 %v2322_v4 }
 0x118   :  { %2205 = vmatpush1.bf16.msra.mxu1 %v2204_v49 }
 0x119   :  { %2206 = vmatprep.subr.bf16.mxu1 %v2322_v4 }
 0x11c   :  { %2208 = vmatpush1.bf16.msra.mxu1 %v2207_v52 }
 0x11d   :  { %2209 = vmatprep.subr.bf16.mxu1 %v2322_v4 }
 0x120   :  { %2211 = vmatpush1.bf16.msra.mxu1 %v2210_v55 }
 0x121   :  { %2212 = vmatprep.subr.bf16.mxu1 %v2322_v4 }
 0x124   :  { %2214 = vmatpush1.bf16.msra.mxu1 %v2213_v60 }
 0x125   :  { %1951 = vmatprep.subr.mxu1 %v2321_v3 }
 0x127   :  { %535 = vmatmul.mubr.f32.vlgmr.msra.gmra.mrb[8].mxu1 %v2715_v15 }
 0x128   :  { %1794 = vmatprep.mubr.msk.f32.mxu1 %vm249_vm0, %v2732_v23  ;;  %1952 = vmatpush3.msk.msra.mxu1 %vm743_vm2, %v2862_v12 }
 0x129   :  { %1977 = vmatprep.subr.mxu1 %v2321_v3 }
 0x12b   :  { %540 = vmatmul.mubr.f32.gmra.mrb[10].mxu1 %v2728_v20  ;;  %v2873_v20 = vpop.permute.xlu1 %615 }
 0x12c   :  { %1795 = vmatprep.mubr.msk.f32.mxu1 %vm249_vm0, %v217_v34 }
 0x12f   :  { %545 = vmatmul.mubr.f32.gmra.mrb[12].mxu1 %v216_v31  ;;  %v2884_v39 = vpop.permute.xlu1 %593 }
 0x130   :  { %1796 = vmatprep.mubr.msk.f32.mxu1 %vm249_vm0, %v219_v42 }
 0x133   :  { %550 = vmatmul.mubr.f32.gmra.mrb[14].mxu1 %v218_v40 }
 0x134   :  { %1953 = vmatprep.mubr.msk.f32.mxu1 %vm2324_vm1, %v2321_v3 }
 0x1d6   :  { %v328_v15 = vpop.f32.mrb[0].mxu1  ;;  %v432_v16 = vpop.f32.mrb[8].mxu0 }
 0x1d7   :  { %v330_v17 = vpop.f32.mrb[1].mxu1  ;;  %v434_v18 = vpop.f32.mrb[9].mxu0  ;;  %v565_v23 = vrot.slane %v328_v15, 7  ;;  %v561_v50 = vadd.f32 %v1797_v24, %v432_v16 }
 0x1da   :  { %v333_v21 = vpop.f32.mrb[2].mxu1  ;;  %v437_v22 = vpop.f32.mrb[10].mxu0 }
 0x1db   :  { %v566_v25 = vrot.slane %v333_v21, 7  ;;  %v335_v26 = vpop.f32.mrb[3].mxu1  ;;  %v439_v27 = vpop.f32.mrb[11].mxu0  ;;  %v562_v28 = vadd.f32 %v1797_v24, %v437_v22 }
 0x1dd   :  { %v574_v29 = vsel %vm571_vm3, %v565_v23, %v566_v25 }
 0x1de   :  { %v597_v30 = vmul.f32 %v2871_v19, %v574_v29  ;;  %v338_v31 = vpop.f32.mrb[4].mxu1  ;;  %v442_v32 = vpop.f32.mrb[12].mxu0 }
 0x1df   :  { %v567_v33 = vrot.slane %v338_v31, 7  ;;  %v340_v34 = vpop.f32.mrb[5].mxu1  ;;  %v444_v35 = vpop.f32.mrb[13].mxu0  ;;  %v563_v37 = vadd.f32 %v1797_v24, %v442_v32 }
 0x1e0   :  { %v601_v36 = vadd.f32 %v597_v30, %v562_v28 }
 0x1e1   :  { %v573_v38 = vsel %vm571_vm3, %v566_v25, %v567_v33  ;;  %v2904_v25 = vpop.permute.xlu1 %630 }
 0x1e2   :  { %v343_v40 = vpop.f32.mrb[6].mxu1  ;;  %v598_v41 = vmul.f32 %v2869_v14, %v573_v38  ;;  %v447_v42 = vpop.f32.mrb[14].mxu0 }
 0x1e3   :  { %v568_v43 = vrot.slane %v343_v40, 7  ;;  %v345_v44 = vpop.f32.mrb[7].mxu1  ;;  %v449_v45 = vpop.f32.mrb[15].mxu0  ;;  %v564_v47 = vadd.f32 %v1797_v24, %v447_v42 }
 0x1e4   :  { %v602_v46 = vadd.f32 %v598_v41, %v563_v37  ;;  %v2902_v24 = vpop.permute.xlu0 %625 }
 0x1e5   :  { %v575_v48 = vsel %vm571_vm3, %v568_v43, %v565_v23  ;;  %v572_v49 = vsel %vm571_vm3, %v567_v33, %v568_v43 }
 0x1e6   :  { %v596_v51 = vmul.f32 %v2867_v13, %v575_v48  ;;  %v599_v52 = vmul.f32 %v2884_v39, %v572_v49 }
 0x1e8   :  { %v600_v53 = vadd.f32 %v596_v51, %v561_v50  ;;  %v603_v54 = vadd.f32 %v599_v52, %v564_v47 }
 0x1fa   :  { %v536_v55 = vpop.f32.mrb[8].mxu1 }
 0x1fb   :  { %v538_v57 = vpop.f32.mrb[9].mxu1  ;;  %v604_v60 = vrot.slane %v536_v55, 1 }
 0x1fe   :  { %v541_v58 = vpop.f32.mrb[10].mxu1 }
 0x1ff   :  { %v605_v61 = vrot.slane %v541_v58, 1  ;;  %v543_v62 = vpop.f32.mrb[11].mxu1 }
 0x201   :  { %v611_v0 = vsel %vm608_vm4, %v604_v60, %v605_v61 }
 0x202   :  { %v633_v1 = vmul.f32 %v2873_v20, %v611_v0  ;;  %v546_v5 = vpop.f32.mrb[12].mxu1 }
 0x203   :  { %v606_v8 = vrot.slane %v546_v5, 1  ;;  %v548_v9 = vpop.f32.mrb[13].mxu1 }
 0x204   :  { %v637_v15 = vadd.f32 %v633_v1, %v600_v53 }
 0x205   :  { %v610_v16 = vsel %vm608_vm4, %v605_v61, %v606_v8 }
 0x206   :  { %v634_v17 = vmul.f32 %v2897_v6, %v610_v16  ;;  %v551_v18 = vpop.f32.mrb[14].mxu1  ;;  %v642_v31 = vsel %vm641_vm5, %v637_v15, 0.0 }
 0x207   :  { %v607_v21 = vrot.slane %v551_v18, 1  ;;  %v553_v22 = vpop.f32.mrb[15].mxu1 }
 0x208   :  { %v638_v23 = vadd.f32 %v634_v17, %v601_v36  ;;  %v1026_v22 = vld [vmem:[%s3180_s12 + $0x8] sm:$0xff] }
 0x209   :  { %v609_v26 = vsel %vm608_vm4, %v606_v8, %v607_v21  ;;  %v612_v27 = vsel %vm608_vm4, %v607_v21, %v604_v60  ;;  %v1025_v21 = vld [vmem:[%s3180_s12] sm:$0xff] }
 0x20a   :  { %v643_v28 = vsel %vm641_vm5, %v638_v23, 0.0  ;;  %v635_v29 = vmul.f32 %v2902_v24, %v609_v26  ;;  %v636_v30 = vmul.f32 %v2904_v25, %v612_v27  ;;  %v1810_v26 = vld [vmem:[%s3180_s12 + $0x48] sm:$0xff]  ;;  %v1811_v27 = vld [vmem:[%s3180_s12 + $0x50] sm:$0xff] }
 0x20b   :  { %v644_v34 = vadd.f32 %v643_v28, %v642_v31  ;;  %v2255_v28 = vpack.c.bf16 %v1811_v27, %v1810_v26  ;;  %v1828_v26 = vld [vmem:[%s3180_s12 + $0xb8] sm:$0xff] }
 0x20c   :  { %v639_v32 = vadd.f32 %v635_v29, %v602_v46  ;;  %v640_v33 = vadd.f32 %v636_v30, %v603_v54  ;;  %v1027_v29 = vld [vmem:[%s3180_s12 + $0x10] sm:$0xff]  ;;  %v1028_v30 = vld [vmem:[%s3180_s12 + $0x18] sm:$0xff] }
 0x20d   :  { %v2243_v31 = vpack.c.bf16 %v1028_v30, %v1027_v29  ;;  %v1829_v29 = vld [vmem:[%s3180_s12 + $0xc0] sm:$0xff]  ;;  %v1830_v30 = vld [vmem:[%s3180_s12 + $0xc8] sm:$0xff] }
 0x20e   :  { %v645_v35 = vsel %vm641_vm5, %v639_v32, 0.0  ;;  %v647_v37 = vsel %vm641_vm5, %v640_v33, 0.0 }
 0x20f   :  { %v646_v36 = vadd.f32 %v645_v35, %v644_v34  ;;  %v1029_v35 = vld [vmem:[%s3180_s12 + $0x20] sm:$0xff] }
 0x211   :  { %v648_v38 = vadd.f32 %v647_v37, %v646_v36  ;;  %v1030_v36 = vld [vmem:[%s3180_s12 + $0x28] sm:$0xff] }
 0x212   :  { %v2247_v37 = vpack.c.bf16 %v1030_v36, %v1029_v35  ;;  %v1379_v36 = vld [vmem:[%s3183_s14 + $0x10] sm:$0xff] }
 0x213   :  { %v649_v40 = vrot.slane %v648_v38, 4 }
 0x215   :  { %v650_v41 = vadd.f32 %v649_v40, %v648_v38  ;;  %v1814_v38 = vld [vmem:[%s3180_s12 + $0x68] sm:$0xff]  ;;  %v1815_v40 = vld [vmem:[%s3180_s12 + $0x70] sm:$0xff] }
 0x217   :  { %v651_v42 = vrot.slane %v650_v41, 2 }
 0x219   :  { %v652_v43 = vadd.f32 %v651_v42, %v650_v41  ;;  %v2263_v41 = vpack.c.bf16 %v1815_v40, %v1814_v38  ;;  %v1031_v42 = vld [vmem:[%s3180_s12 + $0x30] sm:$0xff]  ;;  %v1381_v40 = vld [vmem:[%s3183_s14 + $0x20] sm:$0xff] }
 0x21b   :  { %v653_v44 = vrot.slane %v652_v43, 1 }
 0x21d   :  { %v654_v45 = vadd.f32 %v653_v44, %v652_v43  ;;  %v1032_v43 = vld [vmem:[%s3180_s12 + $0x38] sm:$0xff] }
 0x21e   :  { %v1816_v44 = vld [vmem:[%s3180_s12 + $0x78] sm:$0xff] }
 0x21f   :  { %1949 = vmatmul.mubr.msk.f32.vlgmr.msra.gmra.mrb[16].mxu0 %vm641_vm5, %v654_v45  ;;  %v2251_v45 = vpack.c.bf16 %v1032_v43, %v1031_v42  ;;  %v1383_v43 = vld [vmem:[%s3183_s14 + $0x30] sm:$0xff] }
 0x220   :  { %2229 = vmatpush3.bf16.msra.mxu0 %v2814_v63  ;;  %1974 = vmatprep.mubr.msk.f32.mxu0 %vm2324_vm1, %v2321_v3 }
 0x221   :  { %2230 = vmatprep.subr.bf16.mxu0 %v2322_v4 }
 0x224   :  { %2232 = vmatpush3.bf16.msra.mxu0 %v2824_v2 }
 0x225   :  { %2233 = vmatprep.subr.bf16.mxu0 %v2322_v4 }
 0x228   :  { %2235 = vmatpush3.bf16.msra.mxu0 %v2834_v7 }
 0x229   :  { %2236 = vmatprep.subr.bf16.mxu0 %v2322_v4 }
 0x22c   :  { %2238 = vmatpush3.bf16.msra.mxu0 %v2844_v10 }
 0x22d   :  { %1972 = vmatprep.subr.mxu0 %v2321_v3 }
 0x230   :  { %1973 = vmatpush3.msra.mxu0 %v2851_v11 }
 0x231   :  { %2256 = vmatprep.subr.bf16.mxu0 %v2255_v28 }
 0x2f2   :  { %v733_v63 = vpop.f32.mrb[16].mxu0 }
 0x2f3   :  { %v737_v46 = vmul.f32 0.001953125, %v733_v63  ;;  %v1950_v47 = vpop.f32.mrb[17].mxu0  ;;  %v1817_v63 = vld [vmem:[%s3180_s12 + $0x80] sm:$0xff] }
 0x2f4   :  { %v1033_v47 = vld [vmem:[%s3180_s12 + $0x40] sm:$0xff] }
 0x2f5   :  { %1954 = vmatmul.mubr.msk.f32.vlgmr.msra.gmra.mrb[16].mxu1 %vm739_vm6, %v737_v46  ;;  %v2267_v46 = vpack.c.bf16 %v1817_v63, %v1816_v44  ;;  %v1384_v44 = vld [vmem:[%s3183_s14 + $0x38] sm:$0xff] }
 0x2f6   :  { %1978 = vmatpush3.msk.msra.mxu1 %vm743_vm2, %v2862_v12  ;;  %1979 = vmatprep.mubr.msk.f32.mxu1 %vm2324_vm1, %v2321_v3 }
 0x3c8   :  { %v813_v2 = vpop.f32.mrb[16].mxu1 }
 0x3c9   :  { %v820_v7 = vrot.slane %v813_v2, %v2691_v59  ;;  %v1955_v10 = vpop.f32.mrb[17].mxu1  ;;  %v1818_v2 = vld [vmem:[%s3180_s12 + $0x88] sm:$0xff] }
 0x3ca   :  { %v1824_v10 = vld [vmem:[%s3180_s12 + $0x98] sm:$0xff] }
 0x3cb   :  { %v2934_v48 = vsub.f32 %v637_v15, %v820_v7  ;;  %v2936_v49 = vsub.f32 %v638_v23, %v820_v7  ;;  %v2938_v11 = vsub.f32 %v639_v32, %v820_v7  ;;  %v2940_v50 = vsub.f32 %v640_v33, %v820_v7  ;;  %v1812_v32 = vld [vmem:[%s3180_s12 + $0x58] sm:$0xff]  ;;  %v1813_v33 = vld [vmem:[%s3180_s12 + $0x60] sm:$0xff]  ;;  %v1823_v7 = vld [vmem:[%s3180_s12 + $0x90] sm:$0xff] }
 0x3cc   :  { %v2239_v23 = vpack.c.bf16 %v1026_v22, %v1025_v21  ;;  %v2259_v34 = vpack.c.bf16 %v1813_v33, %v1812_v32  ;;  %v1831_v32 = vld [vmem:[%s3180_s12 + $0xd0] sm:$0xff]  ;;  %v1377_v33 = vld [vmem:[%s3183_s14] sm:$0xff] }
 0x3cd   :  { %v825_v51 = vmul.f32 %v2934_v48, %v2934_v48  ;;  %v826_v12 = vmul.f32 %v2936_v49, %v2936_v49  ;;  %v827_v52 = vmul.f32 %v2938_v11, %v2938_v11  ;;  %v828_v53 = vmul.f32 %v2940_v50, %v2940_v50 }
 0x3ce   :  { %2240 = vmatprep.subr.bf16.mxu1 %v2239_v23 }
 0x3cf   :  { %v829_v54 = vsel %vm641_vm5, %v825_v51, 0.0  ;;  %v830_v55 = vsel %vm641_vm5, %v826_v12, 0.0  ;;  %v832_v58 = vsel %vm641_vm5, %v827_v52, 0.0  ;;  %v834_v61 = vsel %vm641_vm5, %v828_v53, 0.0 }
 0x3d0   :  { %v831_v57 = vadd.f32 %v830_v55, %v829_v54  ;;  %v2271_v51 = vpack.c.bf16 %v1824_v10, %v1823_v7  ;;  %v1836_v10 = vld [vmem:[%s3184_s13] ss:$0 sm:$0xff] }
 0x3d2   :  { %v833_v60 = vadd.f32 %v832_v58, %v831_v57  ;;  %v1804_v57 = vld [vmem:[%s3181_s10] ss:$0 sm:$0xff] }
 0x3d4   :  { %v835_v62 = vadd.f32 %v834_v61, %v833_v60 }
 0x3d6   :  { %v836_v0 = vrot.slane %v835_v62, 4 }
 0x3d8   :  { %v837_v1 = vadd.f32 %v836_v0, %v835_v62  ;;  %v1805_v0 = vld [vmem:[%s3182_s11] ss:$0 sm:$0xff] }
 0x3da   :  { %v838_v5 = vrot.slane %v837_v1, 2 }
 0x3dc   :  { %v839_v8 = vadd.f32 %v838_v5, %v837_v1 }
 0x3de   :  { %v840_v9 = vrot.slane %v839_v8, 1 }
 0x3e0   :  { %v841_v15 = vadd.f32 %v840_v9, %v839_v8 }
 0x3e2   :  { %1975 = vmatmul.mubr.msk.f32.vlgmr.msra.gmra.mrb[18].mxu0 %vm641_vm5, %v841_v15 }
 0x3e3   :  { %2258 = vmatpush3.bf16.msra.mxu0 %v2255_v28 }
 0x3e4   :  { %2260 = vmatprep.subr.bf16.mxu0 %v2259_v34 }
 0x3e7   :  { %2262 = vmatpush3.bf16.msra.mxu0 %v2259_v34  ;;  %v1378_v34 = vld [vmem:[%s3183_s14 + $0x8] sm:$0xff] }
 0x3e8   :  { %2264 = vmatprep.subr.bf16.mxu0 %v2263_v41  ;;  %v2288_v35 = vpack.c.bf16 %v1378_v34, %v1377_v33 }
 0x3eb   :  { %2266 = vmatpush3.bf16.msra.mxu0 %v2263_v41  ;;  %v1382_v41 = vld [vmem:[%s3183_s14 + $0x28] sm:$0xff] }
 0x3ec   :  { %2268 = vmatprep.subr.bf16.mxu0 %v2267_v46  ;;  %v2294_v42 = vpack.c.bf16 %v1382_v41, %v1381_v40 }
 0x3ef   :  { %2270 = vmatpush3.bf16.msra.mxu0 %v2267_v46 }
 0x3f0   :  { %2022 = vmatprep.subr.mxu0 %v1818_v2 }
 0x3f3   :  { %2023 = vmatpush3.msra.mxu0 %v1818_v2 }
 0x3f4   :  { %2287 = vmatprep.subr.bf16.mxu0 %v2322_v4 }
 0x4b5   :  { %v911_v16 = vpop.f32.mrb[18].mxu0 }
 0x4b6   :  { %v915_v17 = vmul.f32 0.001953125, %v911_v16  ;;  %v1976_v18 = vpop.f32.mrb[19].mxu0 }
 0x4b8   :  { %1980 = vmatmul.mubr.msk.f32.vlgmr.msra.gmra.mrb[18].mxu1 %vm739_vm6, %v915_v17 }
 0x4b9   :  { %2242 = vmatpush3.bf16.msra.mxu1 %v2239_v23  ;;  %v1827_v23 = vld [vmem:[%s3180_s12 + $0xb0] sm:$0xff] }
 0x4ba   :  { %2244 = vmatprep.subr.bf16.mxu1 %v2243_v31  ;;  %v2279_v28 = vpack.c.bf16 %v1828_v26, %v1827_v23 }
 0x4bd   :  { %2246 = vmatpush3.bf16.msra.mxu1 %v2243_v31  ;;  %v2283_v31 = vpack.c.bf16 %v1830_v30, %v1829_v29 }
 0x4be   :  { %2248 = vmatprep.subr.bf16.mxu1 %v2247_v37 }
 0x4c1   :  { %2250 = vmatpush3.bf16.msra.mxu1 %v2247_v37  ;;  %v1380_v37 = vld [vmem:[%s3183_s14 + $0x18] sm:$0xff] }
 0x4c2   :  { %2252 = vmatprep.subr.bf16.mxu1 %v2251_v45  ;;  %v2291_v38 = vpack.c.bf16 %v1380_v37, %v1379_v36 }
 0x4c5   :  { %2254 = vmatpush3.bf16.msra.mxu1 %v2251_v45  ;;  %v2297_v45 = vpack.c.bf16 %v1384_v44, %v1383_v43 }
 0x4c6   :  { %1998 = vmatprep.subr.mxu1 %v1033_v47 }
 0x4c9   :  { %1999 = vmatpush3.msra.mxu1 %v1033_v47 }
 0x4ca   :  { %2272 = vmatprep.subr.bf16.mxu1 %v2271_v51 }
 0x58b   :  { %v985_v12 = vpop.f32.mrb[18].mxu1 }
 0x58c   :  { %v986_v52 = vadd.f32 1e-05, %v985_v12  ;;  %v1981_v53 = vpop.f32.mrb[19].mxu1 }
 0x58e   :  { %2317 = vrsqrt.f32 %v986_v52 }
 0x598   :  { %v2318_v54 = vpop.eup %2317 }
 0x599   :  { %v993_v55 = vrot.slane %v2318_v54, %v2691_v59 }
 0x59b   :  { %v994_v58 = vmul.f32 %v993_v55, %v2934_v48  ;;  %v995_v60 = vmul.f32 %v993_v55, %v2936_v49  ;;  %v996_v61 = vmul.f32 %v993_v55, %v2938_v11  ;;  %v997_v62 = vmul.f32 %v993_v55, %v2940_v50  ;;  %v1825_v48 = vld [vmem:[%s3180_s12 + $0xa0] sm:$0xff]  ;;  %v1826_v49 = vld [vmem:[%s3180_s12 + $0xa8] sm:$0xff] }
 0x59c   :  { %v2275_v18 = vpack.c.bf16 %v1826_v49, %v1825_v48 }
 0x59d   :  { %v1004_v1 = vmul.f32 %v1804_v57, %v994_v58  ;;  %v1005_v5 = vmul.f32 %v1804_v57, %v995_v60  ;;  %v1006_v8 = vmul.f32 %v1804_v57, %v996_v61  ;;  %v1007_v9 = vmul.f32 %v1804_v57, %v997_v62 }
 0x59f   :  { %v1014_v15 = vadd.f32 %v1805_v0, %v1004_v1  ;;  %v1015_v16 = vadd.f32 %v1805_v0, %v1005_v5  ;;  %v1016_v17 = vadd.f32 %v1805_v0, %v1006_v8  ;;  %v1017_v21 = vadd.f32 %v1805_v0, %v1007_v9 }
 0x5a1   :  { %v1018_v11 = vmax.f32 %v1014_v15, 0.0  ;;  %v1019_v50 = vmax.f32 %v1015_v16, 0.0  ;;  %v1020_v22 = vmax.f32 %v1016_v17, 0.0  ;;  %v1021_v27 = vmax.f32 %v1017_v21, 0.0 }
 0x5a3   :  { %2000 = vmatprep.mubr.msk.f32.mxu1 %vm641_vm5, %v1018_v11  ;;  %2024 = vmatprep.mubr.msk.f32.mxu0 %vm641_vm5, %v1018_v11 }
 0x5a4   :  { %2001 = vmatmul.mubr.msk.f32.vlgmr.msra.gmra.mrb[20].mxu1 %vm641_vm5, %v1019_v50  ;;  %2025 = vmatmul.mubr.msk.f32.vlgmr.msra.gmra.mrb[20].mxu0 %vm641_vm5, %v1019_v50 }
 0x5a5   :  { %2274 = vmatpush3.bf16.msra.mxu1 %v2271_v51  ;;  %2003 = vmatprep.mubr.msk.f32.mxu1 %vm641_vm5, %v1020_v22 }
 0x5a6   :  { %2027 = vmatprep.mubr.msk.f32.mxu0 %vm641_vm5, %v1020_v22  ;;  %2276 = vmatprep.subr.bf16.mxu1 %v2275_v18 }
 0x5a7   :  { %2289 = vmatpush3.bf16.msra.mxu0 %v2288_v35 }
 0x5a8   :  { %2004 = vmatmul.mubr.msk.f32.gmra.mrb[22].mxu1 %vm641_vm5, %v1021_v27  ;;  %2028 = vmatmul.mubr.msk.f32.gmra.mrb[22].mxu0 %vm641_vm5, %v1021_v27 }
 0x5a9   :  { %2278 = vmatpush3.bf16.msra.mxu1 %v2275_v18  ;;  %2048 = vmatprep.mubr.msk.f32.mxu1 %vm641_vm5, %v1018_v11 }
 0x5aa   :  { %2280 = vmatprep.subr.bf16.mxu1 %v2279_v28  ;;  %2070 = vmatprep.mubr.msk.f32.mxu0 %vm2324_vm1, %v2321_v3 }
 0x5ab   :  { %2290 = vmatprep.subr.bf16.mxu0 %v2322_v4 }
 0x5ac   :  { %2292 = vmatpush3.bf16.msra.mxu0 %v2291_v38 }
 0x5ad   :  { %2282 = vmatpush3.bf16.msra.mxu1 %v2279_v28  ;;  %2293 = vmatprep.subr.bf16.mxu0 %v2322_v4 }
 0x5ae   :  { %2284 = vmatprep.subr.bf16.mxu1 %v2283_v31 }
 0x5b0   :  { %2295 = vmatpush3.bf16.msra.mxu0 %v2294_v42 }
 0x5b1   :  { %2286 = vmatpush3.bf16.msra.mxu1 %v2283_v31  ;;  %2296 = vmatprep.subr.bf16.mxu0 %v2322_v4 }
 0x5b2   :  { %2046 = vmatprep.subr.mxu1 %v1831_v32 }
 0x5b4   :  { %2298 = vmatpush3.bf16.msra.mxu0 %v2297_v45 }
 0x5b5   :  { %2047 = vmatpush3.msra.mxu1 %v1831_v32  ;;  %2073 = vmatprep.subr.mxu0 %v2321_v3 }
 0x5b6   :  { %2049 = vmatmul.mubr.msk.f32.vlgmr.msra.gmra.mrb[24].mxu1 %vm641_vm5, %v1019_v50  ;;  %2299 = vmatprep.subr.bf16.mxu1 %v2322_v4 }
 0x5b7   :  { %2051 = vmatprep.mubr.msk.f32.mxu1 %vm641_vm5, %v1020_v22  ;;  %2301 = vmatpush3.bf16.msra.mxu1 %v2288_v35 }
 0x5b8   :  { %2302 = vmatprep.subr.bf16.mxu1 %v2322_v4 }
 0x5ba   :  { %2052 = vmatmul.mubr.msk.f32.gmra.mrb[26].mxu1 %vm641_vm5, %v1021_v27 }
 0x5bb   :  { %2094 = vmatprep.mubr.msk.f32.mxu1 %vm2324_vm1, %v2321_v3  ;;  %2304 = vmatpush3.bf16.msra.mxu1 %v2291_v38 }
 0x5bc   :  { %2305 = vmatprep.subr.bf16.mxu1 %v2322_v4 }
 0x5bf   :  { %2307 = vmatpush3.bf16.msra.mxu1 %v2294_v42 }
 0x5c0   :  { %2308 = vmatprep.subr.bf16.mxu1 %v2322_v4 }
 0x5c3   :  { %2310 = vmatpush3.bf16.msra.mxu1 %v2297_v45 }
 0x677   :  { %v2002_v63 = vpop.f32.mrb[20].mxu1  ;;  %v2026_v46 = vpop.f32.mrb[20].mxu0 }
 0x678   :  { %v1332_v47 = vrot.slane %v2002_v63, 7  ;;  %v1112_v2 = vpop.f32.mrb[21].mxu1  ;;  %v1207_v7 = vpop.f32.mrb[21].mxu0  ;;  %v1328_v53 = vadd.f32 %v2026_v46, %v1836_v10  ;;  %v1459_v63 = vld [vmem:[%s3185_s15] sm:$0xf] }
 0x679   :  { %v1331_v51 = vrot.slane %v1112_v2, 7  ;;  %v1327_v0 = vadd.f32 %v1836_v10, %v1207_v7 }
 0x67b   :  { %v1337_v12 = vsel %vm571_vm3, %v1331_v51, %v1332_v47  ;;  %v2005_v52 = vpop.f32.mrb[22].mxu1  ;;  %v2029_v4 = vpop.f32.mrb[22].mxu0 }
 0x67c   :  { %v1340_v54 = vmul.f32 %v1337_v12, %v2871_v19  ;;  %v1334_v55 = vrot.slane %v2005_v52, 7  ;;  %v1122_v57 = vpop.f32.mrb[23].mxu1  ;;  %v1217_v58 = vpop.f32.mrb[23].mxu0  ;;  %v1330_v9 = vadd.f32 %v2029_v4, %v1836_v10 }
 0x67d   :  { %v1333_v60 = vrot.slane %v1122_v57, 7  ;;  %v1329_v15 = vadd.f32 %v1836_v10, %v1217_v58 }
 0x67e   :  { %v1344_v61 = vadd.f32 %v1340_v54, %v1328_v53  ;;  %v1338_v62 = vsel %vm571_vm3, %v1334_v55, %v1331_v51 }
 0x67f   :  { %v1339_v1 = vmul.f32 %v1338_v62, %v2867_v13  ;;  %v1335_v5 = vsel %vm571_vm3, %v1333_v60, %v1334_v55  ;;  %v1336_v8 = vsel %vm571_vm3, %v1332_v47, %v1333_v60 }
 0x680   :  { %v1342_v19 = vmul.f32 %v1335_v5, %v2884_v39  ;;  %v1341_v16 = vmul.f32 %v1336_v8, %v2869_v14 }
 0x681   :  { %v1343_v17 = vadd.f32 %v1339_v1, %v1327_v0 }
 0x682   :  { %v1346_v48 = vadd.f32 %v1342_v19, %v1330_v9  ;;  %v1345_v49 = vadd.f32 %v1341_v16, %v1329_v15 }
 0x689   :  { %v2050_v11 = vpop.f32.mrb[24].mxu1 }
 0x68a   :  { %v1348_v50 = vrot.slane %v2050_v11, 1  ;;  %v1302_v18 = vpop.f32.mrb[25].mxu1 }
 0x68b   :  { %v1347_v21 = vrot.slane %v1302_v18, 1 }
 0x68d   :  { %v1353_v13 = vsel %vm608_vm4, %v1347_v21, %v1348_v50  ;;  %v2053_v22 = vpop.f32.mrb[26].mxu1 }
 0x68e   :  { %v1355_v23 = vmul.f32 %v1353_v13, %v2873_v20  ;;  %v1350_v26 = vrot.slane %v2053_v22, 1  ;;  %v1312_v27 = vpop.f32.mrb[27].mxu1 }
 0x68f   :  { %v1349_v28 = vrot.slane %v1312_v27, 1 }
 0x690   :  { %v1359_v39 = vadd.f32 %v1355_v23, %v1343_v17  ;;  %v1354_v14 = vsel %vm608_vm4, %v1350_v26, %v1347_v21  ;;  %v1843_v23 = vld [vmem:[%s3186_s16] ss:$0 sm:$0xff] }
 0x691   :  { %v1358_v29 = vmul.f32 %v1354_v14, %v2904_v25  ;;  %v1351_v30 = vsel %vm608_vm4, %v1349_v28, %v1350_v26  ;;  %v1352_v31 = vsel %vm608_vm4, %v1348_v50, %v1349_v28  ;;  %v1844_v14 = vld [vmem:[%s3187_s17] ss:$0 sm:$0xff] }
 0x692   :  { %v1356_v32 = vmul.f32 %v1352_v31, %v2897_v6  ;;  %v1357_v33 = vmul.f32 %v1351_v30, %v2902_v24  ;;  %v1364_v36 = vsel %vm1363_vm7, %v1359_v39, 0.0 }
 0x693   :  { %v1362_v20 = vadd.f32 %v1358_v29, %v1346_v48 }
 0x694   :  { %v1360_v34 = vadd.f32 %v1356_v32, %v1344_v61  ;;  %v1361_v35 = vadd.f32 %v1357_v33, %v1345_v49 }
 0x695   :  { %v1369_v41 = vsel %vm1363_vm7, %v1362_v20, 0.0 }
 0x696   :  { %v1365_v37 = vsel %vm1363_vm7, %v1360_v34, 0.0  ;;  %v1367_v25 = vsel %vm1363_vm7, %v1361_v35, 0.0 }
 0x697   :  { %v1366_v38 = vadd.f32 %v1365_v37, %v1364_v36 }
 0x699   :  { %v1368_v40 = vadd.f32 %v1367_v25, %v1366_v38 }
 0x69b   :  { %v1370_v56 = vadd.f32 %v1369_v41, %v1368_v40 }
 0x69d   :  { %v1371_v42 = vrot.slane %v1370_v56, 4 }
 0x69f   :  { %v1372_v43 = vadd.f32 %v1371_v42, %v1370_v56 }
 0x6a1   :  { %v1373_v6 = vrot.slane %v1372_v43, 2 }
 0x6a3   :  { %v1374_v44 = vadd.f32 %v1373_v6, %v1372_v43 }
 0x6a5   :  { %v1375_v24 = vrot.slane %v1374_v44, 1 }
 0x6a7   :  { %v1376_v45 = vadd.f32 %v1375_v24, %v1374_v44 }
 0x6a9   :  { %2071 = vmatmul.mubr.msk.f32.vlgmr.msra.gmra.mrb[24].mxu0 %vm1363_vm7, %v1376_v45 }
 0x6aa   :  { %2074 = vmatpush3.msk.msra.mxu0 %vm743_vm2, %v1459_v63  ;;  %2075 = vmatprep.mubr.msk.f32.mxu0 %vm2324_vm1, %v2321_v3 }
 0x6ab   :  { %2097 = vmatprep.subr.mxu0 %v2321_v3 }
 0x77c   :  { %v1454_v46 = vpop.f32.mrb[24].mxu0 }
 0x77d   :  { %v1458_v47 = vmul.f32 0.001953125, %v1454_v46  ;;  %v2072_v2 = vpop.f32.mrb[25].mxu0 }
 0x77f   :  { %2076 = vmatmul.mubr.msk.f32.vlgmr.msra.gmra.mrb[26].mxu0 %vm739_vm6, %v1458_v47 }
 0x780   :  { %2098 = vmatpush3.msk.msra.mxu0 %vm743_vm2, %v1459_v63  ;;  %2099 = vmatprep.mubr.msk.f32.mxu0 %vm2324_vm1, %v2321_v3 }
 0x852   :  { %v1532_v7 = vpop.f32.mrb[26].mxu0 }
 0x853   :  { %v1539_v10 = vrot.slane %v1532_v7, %v2691_v59  ;;  %v2077_v51 = vpop.f32.mrb[27].mxu0 }
 0x855   :  { %v1540_v12 = vsub.f32 %v1359_v39, %v1539_v10  ;;  %v1541_v52 = vsub.f32 %v1360_v34, %v1539_v10  ;;  %v1542_v4 = vsub.f32 %v1361_v35, %v1539_v10  ;;  %v1543_v53 = vsub.f32 %v1362_v20, %v1539_v10 }
 0x857   :  { %v1544_v54 = vmul.f32 %v1540_v12, %v1540_v12  ;;  %v1545_v55 = vmul.f32 %v1541_v52, %v1541_v52  ;;  %v1546_v57 = vmul.f32 %v1542_v4, %v1542_v4  ;;  %v1547_v58 = vmul.f32 %v1543_v53, %v1543_v53 }
 0x859   :  { %v1548_v60 = vsel %vm1363_vm7, %v1544_v54, 0.0  ;;  %v1549_v61 = vsel %vm1363_vm7, %v1545_v55, 0.0  ;;  %v1551_v0 = vsel %vm1363_vm7, %v1546_v57, 0.0  ;;  %v1553_v1 = vsel %vm1363_vm7, %v1547_v58, 0.0 }
 0x85a   :  { %v1550_v62 = vadd.f32 %v1549_v61, %v1548_v60 }
 0x85c   :  { %v1552_v3 = vadd.f32 %v1551_v0, %v1550_v62 }
 0x85e   :  { %v1554_v5 = vadd.f32 %v1553_v1, %v1552_v3 }
 0x860   :  { %v1555_v8 = vrot.slane %v1554_v5, 4 }
 0x862   :  { %v1556_v9 = vadd.f32 %v1555_v8, %v1554_v5 }
 0x864   :  { %v1557_v19 = vrot.slane %v1556_v9, 2 }
 0x866   :  { %v1558_v15 = vadd.f32 %v1557_v19, %v1556_v9 }
 0x868   :  { %v1559_v16 = vrot.slane %v1558_v15, 1 }
 0x86a   :  { %v1560_v17 = vadd.f32 %v1559_v16, %v1558_v15 }
 0x86c   :  { %2095 = vmatmul.mubr.msk.f32.vlgmr.msra.gmra.mrb[28].mxu1 %vm1363_vm7, %v1560_v17 }
 0x93f   :  { %v1630_v48 = vpop.f32.mrb[28].mxu1 }
 0x940   :  { %v1634_v49 = vmul.f32 0.001953125, %v1630_v48  ;;  %v2096_v11 = vpop.f32.mrb[29].mxu1 }
 0x942   :  { %2100 = vmatmul.mubr.msk.f32.vlgmr.msra.gmra.mrb[28].mxu0 %vm739_vm6, %v1634_v49 }
 0xa15   :  { %v1704_v50 = vpop.f32.mrb[28].mxu0 }
 0xa16   :  { %v1705_v18 = vadd.f32 1e-05, %v1704_v50  ;;  %v2101_v21 = vpop.f32.mrb[29].mxu0 }
 0xa18   :  { %2319 = vrsqrt.f32 %v1705_v18 }
 0xa22   :  { %v2320_v13 = vpop.eup %2319 }
 0xa23   :  { %v1712_v22 = vrot.slane %v2320_v13, %v2691_v59 }
 0xa25   :  { %v1713_v26 = vmul.f32 %v1712_v22, %v1540_v12  ;;  %v1714_v27 = vmul.f32 %v1712_v22, %v1541_v52  ;;  %v1715_v28 = vmul.f32 %v1712_v22, %v1542_v4  ;;  %v1716_v39 = vmul.f32 %v1712_v22, %v1543_v53 }
 0xa27   :  { %v1723_v29 = vmul.f32 %v1843_v23, %v1713_v26  ;;  %v1724_v30 = vmul.f32 %v1843_v23, %v1714_v27  ;;  %v1725_v31 = vmul.f32 %v1843_v23, %v1715_v28  ;;  %v1726_v32 = vmul.f32 %v1843_v23, %v1716_v39 }
 0xa29   :  { %v1733_v33 = vadd.f32 %v1844_v14, %v1723_v29  ;;  %v1734_v20 = vadd.f32 %v1844_v14, %v1724_v30  ;;  %v1735_v34 = vadd.f32 %v1844_v14, %v1725_v31  ;;  %v1736_v59 = vadd.f32 %v1844_v14, %v1726_v32 }
 0xa2b   :  { %v1737_v35 = vmax.f32 %v1733_v33, 0.0  ;;  %v1738_v36 = vmax.f32 %v1734_v20, 0.0  ;;  %v1739_v37 = vmax.f32 %v1735_v34, 0.0  ;;  %v1740_v38 = vmax.f32 %v1736_v59, 0.0 }
 0xa2d   :  { %1741 = vst.msk [vmem:[%s3188_s18] sm:$0xff] %vm1363_vm7, %v1737_v35  ;;  %1742 = vst.msk [vmem:[%s3188_s18 + $0x8] sm:$0xff] %vm1363_vm7, %v1738_v36 }
 0xa2e   :  { %1743 = vst.msk [vmem:[%s3188_s18 + $0x10] sm:$0xff] %vm1363_vm7, %v1739_v37  ;;  %1744 = vst.msk [vmem:[%s3188_s18 + $0x18] sm:$0xff] %vm1363_vm7, %v1740_v38 }

</bundles_post_ra>
